<compile_context>
chip_gen: v5e
topology: v5e:2x2
jax: 0.10.0
libtpu: 0.0.40
codegen_flags: <defaults>
</compile_context>

<pallas_src>
import functools

import jax
import jax.numpy as jnp
from jax.experimental import pallas as pl
from jax.experimental.pallas import tpu as pltpu

_VMEM_LIMIT = 32 * 1024 * 1024   # explicit VMEM budget; safe on v5e/v6e/v7x
_BN_EPS = 1e-5


def _pick_tile(dim, align, max_tile):
    """Largest legal tile: the full dim if small, else an aligned divisor."""
    if dim <= max_tile:
        return dim
    t = (max_tile // align) * align
    while t >= align:
        if dim % t == 0:
            return t
        t -= align
    return dim   # no aligned divisor found: fall back to one full-dim block


# ----------------------------------------------------------------------------
# Pallas kernels
# ----------------------------------------------------------------------------
def _matmul_kernel(p_ref, w_ref, o_ref):
    """o[m,n] = sum_k p[m,k] @ w[k,n]; accumulate directly into the f32 output."""
    @pl.when(pl.program_id(2) == 0)
    def _():
        o_ref[...] = jnp.zeros_like(o_ref)

    o_ref[...] += jnp.dot(p_ref[...], w_ref[...],
                          preferred_element_type=jnp.float32)


def pallas_matmul(p, w):
    """p: (M, K) bf16, w: (K, Cout) bf16 -> (M, Cout) f32."""
    M, K = p.shape
    K2, Cout = w.shape
    assert K == K2
    tm = _pick_tile(M, 8, 256)
    tn = _pick_tile(Cout, 128, 256)
    tk = _pick_tile(K, 128, 512)
    grid = (M // tm, Cout // tn, K // tk)
    return pl.pallas_call(
        _matmul_kernel,
        out_shape=jax.ShapeDtypeStruct((M, Cout), jnp.float32),
        grid_spec=pltpu.PrefetchScalarGridSpec(
            num_scalar_prefetch=0,
            grid=grid,
            in_specs=[pl.BlockSpec((tm, tk), lambda m, n, k: (m, k)),
                      pl.BlockSpec((tk, tn), lambda m, n, k: (k, n))],
            out_specs=pl.BlockSpec((tm, tn), lambda m, n, k: (m, n))),
        compiler_params=pltpu.CompilerParams(
            dimension_semantics=("parallel", "parallel", "arbitrary"),
            vmem_limit_bytes=_VMEM_LIMIT),
    )(p, w)


def _bn_stats_kernel(z_ref, sum_ref, sq_ref):
    """Per-channel sum and sum-of-squares, reduced over M-tiles."""
    @pl.when(pl.program_id(0) == 0)
    def _():
        sum_ref[...] = jnp.zeros_like(sum_ref)
        sq_ref[...] = jnp.zeros_like(sq_ref)

    z = z_ref[...]
    sum_ref[...] += jnp.sum(z, axis=0, keepdims=True)
    sq_ref[...] += jnp.sum(z * z, axis=0, keepdims=True)


def pallas_bn_stats(z):
    """z: (M, C) f32 -> (sum (1,C), sumsq (1,C))."""
    M, C = z.shape
    tm = _pick_tile(M, 8, 512)
    grid = (M // tm,)
    return pl.pallas_call(
        _bn_stats_kernel,
        out_shape=(jax.ShapeDtypeStruct((1, C), jnp.float32),
                   jax.ShapeDtypeStruct((1, C), jnp.float32)),
        grid_spec=pltpu.PrefetchScalarGridSpec(
            num_scalar_prefetch=0,
            grid=grid,
            in_specs=[pl.BlockSpec((tm, C), lambda m: (m, 0))],
            out_specs=[pl.BlockSpec((1, C), lambda m: (0, 0)),
                       pl.BlockSpec((1, C), lambda m: (0, 0))]),
        compiler_params=pltpu.CompilerParams(
            dimension_semantics=("arbitrary",),
            vmem_limit_bytes=_VMEM_LIMIT),
    )(z)


def _make_bn_apply_kernel(has_residual, apply_relu):
    """y = z*scale + shift (+ residual) (ReLU), elementwise over an M tile."""
    def kernel(*refs):
        if has_residual:
            z_ref, s_ref, b_ref, r_ref, o_ref = refs
        else:
            z_ref, s_ref, b_ref, o_ref = refs
        y = z_ref[...] * s_ref[...] + b_ref[...]
        if has_residual:
            y = y + r_ref[...]
        if apply_relu:
            y = jnp.maximum(y, 0.0)
        o_ref[...] = y
    return kernel


def pallas_bn_apply(z, scale, shift, residual=None, relu=True):
    M, C = z.shape
    tm = _pick_tile(M, 8, 512)
    grid = (M // tm,)
    has_res = residual is not None
    args = [z, scale.reshape(1, C), shift.reshape(1, C)]
    specs = [pl.BlockSpec((tm, C), lambda m: (m, 0)),
             pl.BlockSpec((1, C), lambda m: (0, 0)),
             pl.BlockSpec((1, C), lambda m: (0, 0))]
    if has_res:
        args.append(residual)
        specs.append(pl.BlockSpec((tm, C), lambda m: (m, 0)))
    return pl.pallas_call(
        _make_bn_apply_kernel(has_res, relu),
        out_shape=jax.ShapeDtypeStruct((M, C), jnp.float32),
        grid_spec=pltpu.PrefetchScalarGridSpec(
            num_scalar_prefetch=0,
            grid=grid,
            in_specs=specs,
            out_specs=pl.BlockSpec((tm, C), lambda m: (m, 0))),
        compiler_params=pltpu.CompilerParams(
            dimension_semantics=("parallel",),
            vmem_limit_bytes=_VMEM_LIMIT),
    )(*args)


# ----------------------------------------------------------------------------
# JAX glue: im2col, conv+BN composition, block forward
# ----------------------------------------------------------------------------
def extract_patches(x, kh, kw, stride, pad):
    """x: (N, H, W, C) -> (N, Ho, Wo, kh*kw*C), channel-fastest per tap."""
    # TODO(synk): fold the kh*kw taps into the matmul grid (direct conv via
    # index_map / manual DMA) to remove the kh*kw x im2col HBM inflation.
    if pad > 0:
        x = jnp.pad(x, ((0, 0), (pad, pad), (pad, pad), (0, 0)))
    N, Hp, Wp, C = x.shape
    Ho = (Hp - kh) // stride + 1
    Wo = (Wp - kw) // stride + 1
    cols = []
    for i in range(kh):
        for j in range(kw):
            cols.append(x[:, i:i + stride * (Ho - 1) + 1:stride,
                          j:j + stride * (Wo - 1) + 1:stride, :])
    return jnp.concatenate(cols, axis=-1), Ho, Wo


def conv_bn(x, w_mat, gamma, beta, stride, residual=None, relu=True):
    """3x3 conv (pad=1, no bias) -> train-mode BN (+residual)(+ReLU).  x: NHWC."""
    N = x.shape[0]
    patches, Ho, Wo = extract_patches(x, 3, 3, stride, 1)
    K = patches.shape[-1]
    M = N * Ho * Wo
    P = patches.reshape(M, K).astype(jnp.bfloat16)   # bf16 feeds the MXU
    Z = pallas_matmul(P, w_mat)                      # (M, Cout) f32
    # BatchNorm with batch statistics (biased variance), per-channel over N*H*W,
    # matching torch BatchNorm2d in training mode on a fresh module.
    s, sq = pallas_bn_stats(Z)
    mean = s[0] / M
    var = sq[0] / M - mean * mean
    inv = jax.lax.rsqrt(var + _BN_EPS)
    scale = gamma * inv
    shift = beta - mean * scale
    res = None if residual is None else residual.reshape(M, -1)
    Y = pallas_bn_apply(Z, scale, shift, residual=res, relu=relu)
    return Y.reshape(N, Ho, Wo, -1)


@functools.partial(jax.jit, static_argnames=("stride",))
def residual_block_forward(params, x, stride):
    """x: NCHW float32 (torch layout); returns NCHW float32."""
    x = jnp.transpose(x, (0, 2, 3, 1)).astype(jnp.float32)   # NCHW -> NHWC
    out = conv_bn(x, params["w1"], params["g1"], params["b1"],
                  stride, relu=True)
    if "wa" in params:
        connection = conv_bn(x, params["wa"], params["ga"], params["ba"],
                             stride, relu=False)
    else:
        connection = x
    out = conv_bn(out, params["w2"], params["g2"], params["b2"], 1,
                  residual=connection, relu=True)
    return jnp.transpose(out, (0, 3, 1, 2))                  # NHWC -> NCHW


# ----------------------------------------------------------------------------
# Deterministic parameter initialization (shapes match the torch module)
# ----------------------------------------------------------------------------
def xavier_conv(key, kh, kw, cin, cout):
    fan_in, fan_out = cin * kh * kw, cout * kh * kw
    bound = (6.0 / (fan_in + fan_out)) ** 0.5
    w = jax.random.uniform(key, (kh, kw, cin, cout), jnp.float32, -bound, bound)
    # im2col layout: rows ordered (tap_i, tap_j, cin), channel fastest.
    return w.reshape(kh * kw * cin, cout).astype(jnp.bfloat16)


def init_block_params(key, cin, cout, stride):
    k1, k2, ka = jax.random.split(key, 3)
    p = {"w1": xavier_conv(k1, 3, 3, cin, cout),
         "g1": jnp.ones((cout,), jnp.float32),
         "b1": jnp.zeros((cout,), jnp.float32),
         "w2": xavier_conv(k2, 3, 3, cout, cout),
         "g2": jnp.ones((cout,), jnp.float32),
         "b2": jnp.zeros((cout,), jnp.float32)}
    if stride != 1 or cin != cout:
        # TODO(synk): torch uses default kaiming init for the input_adjust conv;
        # we reuse the deterministic xavier-uniform scheme here.
        p["wa"] = xavier_conv(ka, 3, 3, cin, cout)
        p["ga"] = jnp.ones((cout,), jnp.float32)
        p["ba"] = jnp.zeros((cout,), jnp.float32)
    return p


if __name__ == "__main__":
    key = jax.random.PRNGKey(0)
    pkey, xkey = jax.random.split(key)
    IN_C, OUT_C, STRIDE = 4, 8, 2
    params = init_block_params(pkey, IN_C, OUT_C, STRIDE)
    x = jax.random.normal(xkey, (2, IN_C, 16, 16), jnp.float32)   # NCHW
    out = residual_block_forward(params, x, STRIDE)
    out = jax.block_until_ready(out)
    assert out.shape == (2, OUT_C, 8, 8), out.shape
    assert bool(jnp.all(jnp.isfinite(out)))
    assert bool(jnp.all(out >= 0.0))   # final ReLU
    print("KERNEL_OK")
</pallas_src>

<mosaic_0001>
module attributes {stable_mosaic.version = 11 : i64} {
  func.func @_bn_stats_kernel(%arg0: i32, %arg1: memref<128x8xf32, #tpu.memory_space<vmem>>, %arg2: memref<1x8xf32, #tpu.memory_space<vmem>>, %arg3: memref<1x8xf32, #tpu.memory_space<vmem>>) attributes {dimension_semantics = [#tpu.dimension_semantics<arbitrary>], iteration_bounds = array<i64: 1>, scalar_prefetch = 0 : i64, scratch_operands = 0 : i64, tpu.core_type = #tpu.core_type<tc>, window_params = [{transform_indices = @transform_0, window_bounds = array<i64: 128, 8>}, {pipeline_mode = #tpu.pipeline_mode<synchronous>, transform_indices = @transform_1, window_bounds = array<i64: 1, 8>}, {pipeline_mode = #tpu.pipeline_mode<synchronous>, transform_indices = @transform_2, window_bounds = array<i64: 1, 8>}]} {
    %c0_i32 = arith.constant 0 : i32
    %0 = arith.cmpi eq, %arg0, %c0_i32 : i32
    %1 = arith.extui %0 : i1 to i32
    %c0_i32_0 = arith.constant 0 : i32
    %2 = arith.cmpi ne, %1, %c0_i32_0 : i32
    scf.if %2 {
      %cst_11 = arith.constant 0.000000e+00 : f32
      %15 = vector.broadcast %cst_11 : f32 to vector<1x8xf32>
      %c0_12 = arith.constant 0 : index
      %c0_13 = arith.constant 0 : index
      %16 = vector.load %arg2[%c0_12, %c0_13] : memref<1x8xf32, #tpu.memory_space<vmem>>, vector<1x8xf32>
      tpu.vector_store %arg2[%c0_12, %c0_13], %15 {strides = array<i32>} : memref<1x8xf32, #tpu.memory_space<vmem>>, vector<1x8xf32>,
      %cst_14 = arith.constant 0.000000e+00 : f32
      %17 = vector.broadcast %cst_14 : f32 to vector<1x8xf32>
      %c0_15 = arith.constant 0 : index
      %c0_16 = arith.constant 0 : index
      %18 = vector.load %arg3[%c0_15, %c0_16] : memref<1x8xf32, #tpu.memory_space<vmem>>, vector<1x8xf32>
      tpu.vector_store %arg3[%c0_15, %c0_16], %17 {strides = array<i32>} : memref<1x8xf32, #tpu.memory_space<vmem>>, vector<1x8xf32>,
    } else {
    }
    %c0 = arith.constant 0 : index
    %c0_1 = arith.constant 0 : index
    %3 = vector.load %arg1[%c0, %c0_1] : memref<128x8xf32, #tpu.memory_space<vmem>>, vector<128x8xf32>
    %c0_2 = arith.constant 0 : index
    %c0_3 = arith.constant 0 : index
    %4 = vector.load %arg2[%c0_2, %c0_3] : memref<1x8xf32, #tpu.memory_space<vmem>>, vector<1x8xf32>
    %cst = arith.constant dense<0.000000e+00> : vector<8xf32>
    %5 = vector.multi_reduction <add>, %3, %cst [0] : vector<128x8xf32> to vector<8xf32>
    %6 = vector.shape_cast %5 : vector<8xf32> to vector<1x8xf32>
    %7 = arith.addf %4, %6 : vector<1x8xf32>
    %c0_4 = arith.constant 0 : index
    %c0_5 = arith.constant 0 : index
    %8 = vector.load %arg2[%c0_4, %c0_5] : memref<1x8xf32, #tpu.memory_space<vmem>>, vector<1x8xf32>
    tpu.vector_store %arg2[%c0_4, %c0_5], %7 {strides = array<i32>} : memref<1x8xf32, #tpu.memory_space<vmem>>, vector<1x8xf32>,
    %c0_6 = arith.constant 0 : index
    %c0_7 = arith.constant 0 : index
    %9 = vector.load %arg3[%c0_6, %c0_7] : memref<1x8xf32, #tpu.memory_space<vmem>>, vector<1x8xf32>
    %10 = arith.mulf %3, %3 : vector<128x8xf32>
    %cst_8 = arith.constant dense<0.000000e+00> : vector<8xf32>
    %11 = vector.multi_reduction <add>, %10, %cst_8 [0] : vector<128x8xf32> to vector<8xf32>
    %12 = vector.shape_cast %11 : vector<8xf32> to vector<1x8xf32>
    %13 = arith.addf %9, %12 : vector<1x8xf32>
    %c0_9 = arith.constant 0 : index
    %c0_10 = arith.constant 0 : index
    %14 = vector.load %arg3[%c0_9, %c0_10] : memref<1x8xf32, #tpu.memory_space<vmem>>, vector<1x8xf32>
    tpu.vector_store %arg3[%c0_9, %c0_10], %13 {strides = array<i32>} : memref<1x8xf32, #tpu.memory_space<vmem>>, vector<1x8xf32>,
    return
  }
  func.func @transform_0(%arg0: i32) -> (i32, i32) {
    %c0_i32 = arith.constant 0 : i32
    %c0_i32_0 = arith.constant 0 : i32
    return %arg0, %c0_i32 : i32, i32
  }
  func.func @transform_1(%arg0: i32) -> (i32, i32) {
    %c0_i32 = arith.constant 0 : i32
    %c0_i32_0 = arith.constant 0 : i32
    %c0_i32_1 = arith.constant 0 : i32
    return %c0_i32, %c0_i32_0 : i32, i32
  }
  func.func @transform_2(%arg0: i32) -> (i32, i32) {
    %c0_i32 = arith.constant 0 : i32
    %c0_i32_0 = arith.constant 0 : i32
    %c0_i32_1 = arith.constant 0 : i32
    return %c0_i32, %c0_i32_0 : i32, i32
  }
}

module attributes {stable_mosaic.version = 11 : i64} {
  func.func @_matmul_kernel(%arg0: i32, %arg1: i32, %arg2: i32, %arg3: memref<128x36xbf16, #tpu.memory_space<vmem>>, %arg4: memref<36x8xbf16, #tpu.memory_space<vmem>>, %arg5: memref<128x8xf32, #tpu.memory_space<vmem>>) attributes {dimension_semantics = [#tpu.dimension_semantics<parallel>, #tpu.dimension_semantics<parallel>, #tpu.dimension_semantics<arbitrary>], iteration_bounds = array<i64: 1, 1, 1>, scalar_prefetch = 0 : i64, scratch_operands = 0 : i64, tpu.core_type = #tpu.core_type<tc>, window_params = [{transform_indices = @transform_0, window_bounds = array<i64: 128, 36>}, {transform_indices = @transform_1, window_bounds = array<i64: 36, 8>}, {transform_indices = @transform_2, window_bounds = array<i64: 128, 8>}]} {
    %c0_i32 = arith.constant 0 : i32
    %0 = arith.cmpi eq, %arg2, %c0_i32 : i32
    %1 = arith.extui %0 : i1 to i32
    %c0_i32_0 = arith.constant 0 : i32
    %2 = arith.cmpi ne, %1, %c0_i32_0 : i32
    scf.if %2 {
      %cst_8 = arith.constant 0.000000e+00 : f32
      %9 = vector.broadcast %cst_8 : f32 to vector<128x8xf32>
      %c0_9 = arith.constant 0 : index
      %c0_10 = arith.constant 0 : index
      %10 = vector.load %arg5[%c0_9, %c0_10] : memref<128x8xf32, #tpu.memory_space<vmem>>, vector<128x8xf32>
      tpu.vector_store %arg5[%c0_9, %c0_10], %9 {strides = array<i32>} : memref<128x8xf32, #tpu.memory_space<vmem>>, vector<128x8xf32>,
    } else {
    }
    %c0 = arith.constant 0 : index
    %c0_1 = arith.constant 0 : index
    %3 = vector.load %arg5[%c0, %c0_1] : memref<128x8xf32, #tpu.memory_space<vmem>>, vector<128x8xf32>
    %c0_2 = arith.constant 0 : index
    %c0_3 = arith.constant 0 : index
    %4 = vector.load %arg3[%c0_2, %c0_3] : memref<128x36xbf16, #tpu.memory_space<vmem>>, vector<128x36xbf16>
    %c0_4 = arith.constant 0 : index
    %c0_5 = arith.constant 0 : index
    %5 = vector.load %arg4[%c0_4, %c0_5] : memref<36x8xbf16, #tpu.memory_space<vmem>>, vector<36x8xbf16>
    %cst = arith.constant dense<0.000000e+00> : vector<128x8xf32>
    %6 = tpu.matmul %4, %5, %cst {dimension_numbers = #tpu.dot_dimension_numbers<[1], [0], [0], [1], [0, 0, 1, 1], [], []>} : vector<128x36xbf16>, vector<36x8xbf16>, vector<128x8xf32> -> vector<128x8xf32>
    %7 = arith.addf %3, %6 : vector<128x8xf32>
    %c0_6 = arith.constant 0 : index
    %c0_7 = arith.constant 0 : index
    %8 = vector.load %arg5[%c0_6, %c0_7] : memref<128x8xf32, #tpu.memory_space<vmem>>, vector<128x8xf32>
    tpu.vector_store %arg5[%c0_6, %c0_7], %7 {strides = array<i32>} : memref<128x8xf32, #tpu.memory_space<vmem>>, vector<128x8xf32>,
    return
  }
  func.func @transform_0(%arg0: i32, %arg1: i32, %arg2: i32) -> (i32, i32) {
    %c0_i32 = arith.constant 0 : i32
    return %arg0, %arg2 : i32, i32
  }
  func.func @transform_1(%arg0: i32, %arg1: i32, %arg2: i32) -> (i32, i32) {
    %c0_i32 = arith.constant 0 : i32
    return %arg2, %arg1 : i32, i32
  }
  func.func @transform_2(%arg0: i32, %arg1: i32, %arg2: i32) -> (i32, i32) {
    %c0_i32 = arith.constant 0 : i32
    return %arg0, %arg1 : i32, i32
  }
}

module attributes {stable_mosaic.version = 11 : i64} {
  func.func @kernel(%arg0: i32, %arg1: memref<128x8xf32, #tpu.memory_space<vmem>>, %arg2: memref<1x8xf32, #tpu.memory_space<vmem>>, %arg3: memref<1x8xf32, #tpu.memory_space<vmem>>, %arg4: memref<128x8xf32, #tpu.memory_space<vmem>>) attributes {dimension_semantics = [#tpu.dimension_semantics<parallel>], iteration_bounds = array<i64: 1>, scalar_prefetch = 0 : i64, scratch_operands = 0 : i64, tpu.core_type = #tpu.core_type<tc>, window_params = [{transform_indices = @transform_0, window_bounds = array<i64: 128, 8>}, {pipeline_mode = #tpu.pipeline_mode<synchronous>, transform_indices = @transform_1, window_bounds = array<i64: 1, 8>}, {pipeline_mode = #tpu.pipeline_mode<synchronous>, transform_indices = @transform_2, window_bounds = array<i64: 1, 8>}, {transform_indices = @transform_3, window_bounds = array<i64: 128, 8>}]} {
    %c0 = arith.constant 0 : index
    %c0_0 = arith.constant 0 : index
    %0 = vector.load %arg1[%c0, %c0_0] : memref<128x8xf32, #tpu.memory_space<vmem>>, vector<128x8xf32>
    %c0_1 = arith.constant 0 : index
    %c0_2 = arith.constant 0 : index
    %1 = vector.load %arg2[%c0_1, %c0_2] : memref<1x8xf32, #tpu.memory_space<vmem>>, vector<1x8xf32>
    %2 = vector.broadcast %1 : vector<1x8xf32> to vector<128x8xf32>
    %3 = arith.mulf %0, %2 : vector<128x8xf32>
    %c0_3 = arith.constant 0 : index
    %c0_4 = arith.constant 0 : index
    %4 = vector.load %arg3[%c0_3, %c0_4] : memref<1x8xf32, #tpu.memory_space<vmem>>, vector<1x8xf32>
    %5 = vector.broadcast %4 : vector<1x8xf32> to vector<128x8xf32>
    %6 = arith.addf %3, %5 : vector<128x8xf32>
    %c0_5 = arith.constant 0 : index
    %c0_6 = arith.constant 0 : index
    %7 = vector.load %arg4[%c0_5, %c0_6] : memref<128x8xf32, #tpu.memory_space<vmem>>, vector<128x8xf32>
    tpu.vector_store %arg4[%c0_5, %c0_6], %6 {strides = array<i32>} : memref<128x8xf32, #tpu.memory_space<vmem>>, vector<128x8xf32>,
    return
  }
  func.func @transform_0(%arg0: i32) -> (i32, i32) {
    %c0_i32 = arith.constant 0 : i32
    %c0_i32_0 = arith.constant 0 : i32
    return %arg0, %c0_i32 : i32, i32
  }
  func.func @transform_1(%arg0: i32) -> (i32, i32) {
    %c0_i32 = arith.constant 0 : i32
    %c0_i32_0 = arith.constant 0 : i32
    %c0_i32_1 = arith.constant 0 : i32
    return %c0_i32, %c0_i32_0 : i32, i32
  }
  func.func @transform_2(%arg0: i32) -> (i32, i32) {
    %c0_i32 = arith.constant 0 : i32
    %c0_i32_0 = arith.constant 0 : i32
    %c0_i32_1 = arith.constant 0 : i32
    return %c0_i32, %c0_i32_0 : i32, i32
  }
  func.func @transform_3(%arg0: i32) -> (i32, i32) {
    %c0_i32 = arith.constant 0 : i32
    %c0_i32_0 = arith.constant 0 : i32
    return %arg0, %c0_i32 : i32, i32
  }
}

module attributes {stable_mosaic.version = 11 : i64} {
  func.func @kernel(%arg0: i32, %arg1: memref<128x8xf32, #tpu.memory_space<vmem>>, %arg2: memref<1x8xf32, #tpu.memory_space<vmem>>, %arg3: memref<1x8xf32, #tpu.memory_space<vmem>>, %arg4: memref<128x8xf32, #tpu.memory_space<vmem>>) attributes {dimension_semantics = [#tpu.dimension_semantics<parallel>], iteration_bounds = array<i64: 1>, scalar_prefetch = 0 : i64, scratch_operands = 0 : i64, tpu.core_type = #tpu.core_type<tc>, window_params = [{transform_indices = @transform_0, window_bounds = array<i64: 128, 8>}, {pipeline_mode = #tpu.pipeline_mode<synchronous>, transform_indices = @transform_1, window_bounds = array<i64: 1, 8>}, {pipeline_mode = #tpu.pipeline_mode<synchronous>, transform_indices = @transform_2, window_bounds = array<i64: 1, 8>}, {transform_indices = @transform_3, window_bounds = array<i64: 128, 8>}]} {
    %c0 = arith.constant 0 : index
    %c0_0 = arith.constant 0 : index
    %0 = vector.load %arg1[%c0, %c0_0] : memref<128x8xf32, #tpu.memory_space<vmem>>, vector<128x8xf32>
    %c0_1 = arith.constant 0 : index
    %c0_2 = arith.constant 0 : index
    %1 = vector.load %arg2[%c0_1, %c0_2] : memref<1x8xf32, #tpu.memory_space<vmem>>, vector<1x8xf32>
    %2 = vector.broadcast %1 : vector<1x8xf32> to vector<128x8xf32>
    %3 = arith.mulf %0, %2 : vector<128x8xf32>
    %c0_3 = arith.constant 0 : index
    %c0_4 = arith.constant 0 : index
    %4 = vector.load %arg3[%c0_3, %c0_4] : memref<1x8xf32, #tpu.memory_space<vmem>>, vector<1x8xf32>
    %5 = vector.broadcast %4 : vector<1x8xf32> to vector<128x8xf32>
    %6 = arith.addf %3, %5 : vector<128x8xf32>
    %cst = arith.constant 0.000000e+00 : f32
    %7 = vector.broadcast %cst : f32 to vector<128x8xf32>
    %8 = arith.maximumf %6, %7 : vector<128x8xf32>
    %c0_5 = arith.constant 0 : index
    %c0_6 = arith.constant 0 : index
    %9 = vector.load %arg4[%c0_5, %c0_6] : memref<128x8xf32, #tpu.memory_space<vmem>>, vector<128x8xf32>
    tpu.vector_store %arg4[%c0_5, %c0_6], %8 {strides = array<i32>} : memref<128x8xf32, #tpu.memory_space<vmem>>, vector<128x8xf32>,
    return
  }
  func.func @transform_0(%arg0: i32) -> (i32, i32) {
    %c0_i32 = arith.constant 0 : i32
    %c0_i32_0 = arith.constant 0 : i32
    return %arg0, %c0_i32 : i32, i32
  }
  func.func @transform_1(%arg0: i32) -> (i32, i32) {
    %c0_i32 = arith.constant 0 : i32
    %c0_i32_0 = arith.constant 0 : i32
    %c0_i32_1 = arith.constant 0 : i32
    return %c0_i32, %c0_i32_0 : i32, i32
  }
  func.func @transform_2(%arg0: i32) -> (i32, i32) {
    %c0_i32 = arith.constant 0 : i32
    %c0_i32_0 = arith.constant 0 : i32
    %c0_i32_1 = arith.constant 0 : i32
    return %c0_i32, %c0_i32_0 : i32, i32
  }
  func.func @transform_3(%arg0: i32) -> (i32, i32) {
    %c0_i32 = arith.constant 0 : i32
    %c0_i32_0 = arith.constant 0 : i32
    return %arg0, %c0_i32 : i32, i32
  }
}

module attributes {stable_mosaic.version = 11 : i64} {
  func.func @_matmul_kernel(%arg0: i32, %arg1: i32, %arg2: i32, %arg3: memref<128x72xbf16, #tpu.memory_space<vmem>>, %arg4: memref<72x8xbf16, #tpu.memory_space<vmem>>, %arg5: memref<128x8xf32, #tpu.memory_space<vmem>>) attributes {dimension_semantics = [#tpu.dimension_semantics<parallel>, #tpu.dimension_semantics<parallel>, #tpu.dimension_semantics<arbitrary>], iteration_bounds = array<i64: 1, 1, 1>, scalar_prefetch = 0 : i64, scratch_operands = 0 : i64, tpu.core_type = #tpu.core_type<tc>, window_params = [{transform_indices = @transform_0, window_bounds = array<i64: 128, 72>}, {transform_indices = @transform_1, window_bounds = array<i64: 72, 8>}, {transform_indices = @transform_2, window_bounds = array<i64: 128, 8>}]} {
    %c0_i32 = arith.constant 0 : i32
    %0 = arith.cmpi eq, %arg2, %c0_i32 : i32
    %1 = arith.extui %0 : i1 to i32
    %c0_i32_0 = arith.constant 0 : i32
    %2 = arith.cmpi ne, %1, %c0_i32_0 : i32
    scf.if %2 {
      %cst_8 = arith.constant 0.000000e+00 : f32
      %9 = vector.broadcast %cst_8 : f32 to vector<128x8xf32>
      %c0_9 = arith.constant 0 : index
      %c0_10 = arith.constant 0 : index
      %10 = vector.load %arg5[%c0_9, %c0_10] : memref<128x8xf32, #tpu.memory_space<vmem>>, vector<128x8xf32>
      tpu.vector_store %arg5[%c0_9, %c0_10], %9 {strides = array<i32>} : memref<128x8xf32, #tpu.memory_space<vmem>>, vector<128x8xf32>,
    } else {
    }
    %c0 = arith.constant 0 : index
    %c0_1 = arith.constant 0 : index
    %3 = vector.load %arg5[%c0, %c0_1] : memref<128x8xf32, #tpu.memory_space<vmem>>, vector<128x8xf32>
    %c0_2 = arith.constant 0 : index
    %c0_3 = arith.constant 0 : index
    %4 = vector.load %arg3[%c0_2, %c0_3] : memref<128x72xbf16, #tpu.memory_space<vmem>>, vector<128x72xbf16>
    %c0_4 = arith.constant 0 : index
    %c0_5 = arith.constant 0 : index
    %5 = vector.load %arg4[%c0_4, %c0_5] : memref<72x8xbf16, #tpu.memory_space<vmem>>, vector<72x8xbf16>
    %cst = arith.constant dense<0.000000e+00> : vector<128x8xf32>
    %6 = tpu.matmul %4, %5, %cst {dimension_numbers = #tpu.dot_dimension_numbers<[1], [0], [0], [1], [0, 0, 1, 1], [], []>} : vector<128x72xbf16>, vector<72x8xbf16>, vector<128x8xf32> -> vector<128x8xf32>
    %7 = arith.addf %3, %6 : vector<128x8xf32>
    %c0_6 = arith.constant 0 : index
    %c0_7 = arith.constant 0 : index
    %8 = vector.load %arg5[%c0_6, %c0_7] : memref<128x8xf32, #tpu.memory_space<vmem>>, vector<128x8xf32>
    tpu.vector_store %arg5[%c0_6, %c0_7], %7 {strides = array<i32>} : memref<128x8xf32, #tpu.memory_space<vmem>>, vector<128x8xf32>,
    return
  }
  func.func @transform_0(%arg0: i32, %arg1: i32, %arg2: i32) -> (i32, i32) {
    %c0_i32 = arith.constant 0 : i32
    return %arg0, %arg2 : i32, i32
  }
  func.func @transform_1(%arg0: i32, %arg1: i32, %arg2: i32) -> (i32, i32) {
    %c0_i32 = arith.constant 0 : i32
    return %arg2, %arg1 : i32, i32
  }
  func.func @transform_2(%arg0: i32, %arg1: i32, %arg2: i32) -> (i32, i32) {
    %c0_i32 = arith.constant 0 : i32
    return %arg0, %arg1 : i32, i32
  }
}

module attributes {stable_mosaic.version = 11 : i64} {
  func.func @kernel(%arg0: i32, %arg1: memref<128x8xf32, #tpu.memory_space<vmem>>, %arg2: memref<1x8xf32, #tpu.memory_space<vmem>>, %arg3: memref<1x8xf32, #tpu.memory_space<vmem>>, %arg4: memref<128x8xf32, #tpu.memory_space<vmem>>, %arg5: memref<128x8xf32, #tpu.memory_space<vmem>>) attributes {dimension_semantics = [#tpu.dimension_semantics<parallel>], iteration_bounds = array<i64: 1>, scalar_prefetch = 0 : i64, scratch_operands = 0 : i64, tpu.core_type = #tpu.core_type<tc>, window_params = [{transform_indices = @transform_0, window_bounds = array<i64: 128, 8>}, {pipeline_mode = #tpu.pipeline_mode<synchronous>, transform_indices = @transform_1, window_bounds = array<i64: 1, 8>}, {pipeline_mode = #tpu.pipeline_mode<synchronous>, transform_indices = @transform_2, window_bounds = array<i64: 1, 8>}, {transform_indices = @transform_3, window_bounds = array<i64: 128, 8>}, {transform_indices = @transform_4, window_bounds = array<i64: 128, 8>}]} {
    %c0 = arith.constant 0 : index
    %c0_0 = arith.constant 0 : index
    %0 = vector.load %arg1[%c0, %c0_0] : memref<128x8xf32, #tpu.memory_space<vmem>>, vector<128x8xf32>
    %c0_1 = arith.constant 0 : index
    %c0_2 = arith.constant 0 : index
    %1 = vector.load %arg2[%c0_1, %c0_2] : memref<1x8xf32, #tpu.memory_space<vmem>>, vector<1x8xf32>
    %2 = vector.broadcast %1 : vector<1x8xf32> to vector<128x8xf32>
    %3 = arith.mulf %0, %2 : vector<128x8xf32>
    %c0_3 = arith.constant 0 : index
    %c0_4 = arith.constant 0 : index
    %4 = vector.load %arg3[%c0_3, %c0_4] : memref<1x8xf32, #tpu.memory_space<vmem>>, vector<1x8xf32>
    %5 = vector.broadcast %4 : vector<1x8xf32> to vector<128x8xf32>
    %6 = arith.addf %3, %5 : vector<128x8xf32>
    %c0_5 = arith.constant 0 : index
    %c0_6 = arith.constant 0 : index
    %7 = vector.load %arg4[%c0_5, %c0_6] : memref<128x8xf32, #tpu.memory_space<vmem>>, vector<128x8xf32>
    %8 = arith.addf %6, %7 : vector<128x8xf32>
    %cst = arith.constant 0.000000e+00 : f32
    %9 = vector.broadcast %cst : f32 to vector<128x8xf32>
    %10 = arith.maximumf %8, %9 : vector<128x8xf32>
    %c0_7 = arith.constant 0 : index
    %c0_8 = arith.constant 0 : index
    %11 = vector.load %arg5[%c0_7, %c0_8] : memref<128x8xf32, #tpu.memory_space<vmem>>, vector<128x8xf32>
    tpu.vector_store %arg5[%c0_7, %c0_8], %10 {strides = array<i32>} : memref<128x8xf32, #tpu.memory_space<vmem>>, vector<128x8xf32>,
    return
  }
  func.func @transform_0(%arg0: i32) -> (i32, i32) {
    %c0_i32 = arith.constant 0 : i32
    %c0_i32_0 = arith.constant 0 : i32
    return %arg0, %c0_i32 : i32, i32
  }
  func.func @transform_1(%arg0: i32) -> (i32, i32) {
    %c0_i32 = arith.constant 0 : i32
    %c0_i32_0 = arith.constant 0 : i32
    %c0_i32_1 = arith.constant 0 : i32
    return %c0_i32, %c0_i32_0 : i32, i32
  }
  func.func @transform_2(%arg0: i32) -> (i32, i32) {
    %c0_i32 = arith.constant 0 : i32
    %c0_i32_0 = arith.constant 0 : i32
    %c0_i32_1 = arith.constant 0 : i32
    return %c0_i32, %c0_i32_0 : i32, i32
  }
  func.func @transform_3(%arg0: i32) -> (i32, i32) {
    %c0_i32 = arith.constant 0 : i32
    %c0_i32_0 = arith.constant 0 : i32
    return %arg0, %c0_i32 : i32, i32
  }
  func.func @transform_4(%arg0: i32) -> (i32, i32) {
    %c0_i32 = arith.constant 0 : i32
    %c0_i32_0 = arith.constant 0 : i32
    return %arg0, %c0_i32 : i32, i32
  }
}

</mosaic_0001>

<bundles_post_ra>
// kernel: residual_block_forward.13
= control target key start
LH: loop header
LB: loop body
LE: loop exit
PB: predicated region body
PF: predicated region fallthrough
CT: control target
= control target key end

     0   :  { %vm14_vm0 = vcmask 57344   ;;  %vm34_vm1 = vcmask 64512   ;;  %v140_v0 = vmov 0.0   ;;  %s258_s0 = inlined_call_operand.vmem [shape: f32[128,8], index: 0, kind: input, shape index: {}]   ;;  %s259_s1 = inlined_call_operand.vmem [shape: f32[1,8], index: 1, kind: output, shape index: {0}]   ;;  %s260_s2 = inlined_call_operand.vmem [shape: f32[1,8], index: 2, kind: output, shape index: {1}]  }
   0x1   :  { %15 = vst.msk [vmem:[%s259_s1] sm:$0x1] %vm14_vm0, %v140_v0  ;;  %v17_v1 = vld [vmem:[%s258_s0] sm:$0xff]  ;;  %v18_v2 = vld [vmem:[%s258_s0 + $0x8] sm:$0xff]  ;;  %v19_v3 = vld [vmem:[%s258_s0 + $0x10] sm:$0xff] }
   0x2   :  { %v35_v4 = vsel %vm34_vm1, %v17_v1, 0.0  ;;  %v36_v5 = vsel %vm34_vm1, %v18_v2, 0.0  ;;  %v38_v6 = vsel %vm34_vm1, %v19_v3, 0.0  ;;  %v20_v7 = vld [vmem:[%s258_s0 + $0x18] sm:$0xff]  ;;  %v21_v10 = vld [vmem:[%s258_s0 + $0x20] sm:$0xff]  ;;  %v22_v13 = vld [vmem:[%s258_s0 + $0x28] sm:$0xff]  ;;  %v76_v15 = vmul.f32 %v17_v1, %v17_v1 }
   0x3   :  { %v37_v8 = vadd.f32 %v36_v5, %v35_v4  ;;  %v40_v9 = vsel %vm34_vm1, %v20_v7, 0.0  ;;  %v42_v12 = vsel %vm34_vm1, %v21_v10, 0.0  ;;  %16 = vst.msk [vmem:[%s260_s2] sm:$0x1] %vm14_vm0, %v140_v0  ;;  %v77_v16 = vmul.f32 %v18_v2, %v18_v2  ;;  %v23_v19 = vld [vmem:[%s258_s0 + $0x30] sm:$0xff]  ;;  %v24_v24 = vld [vmem:[%s258_s0 + $0x38] sm:$0xff] }
   0x4   :  { %v78_v17 = vmul.f32 %v19_v3, %v19_v3  ;;  %v44_v18 = vsel %vm34_vm1, %v22_v13, 0.0  ;;  %v79_v21 = vmul.f32 %v20_v7, %v20_v7  ;;  %v46_v22 = vsel %vm34_vm1, %v23_v19, 0.0  ;;  %v25_v31 = vld [vmem:[%s258_s0 + $0x40] sm:$0xff]  ;;  %v26_v37 = vld [vmem:[%s258_s0 + $0x48] sm:$0xff]  ;;  %v27_v43 = vld [vmem:[%s258_s0 + $0x50] sm:$0xff] }
   0x5   :  { %v39_v11 = vadd.f32 %v38_v6, %v37_v8  ;;  %v80_v23 = vmul.f32 %v21_v10, %v21_v10  ;;  %v92_v26 = vsel %vm34_vm1, %v76_v15, 0.0  ;;  %v93_v27 = vsel %vm34_vm1, %v77_v16, 0.0  ;;  %v28_v49 = vld [vmem:[%s258_s0 + $0x58] sm:$0xff]  ;;  %v29_v55 = vld [vmem:[%s258_s0 + $0x60] sm:$0xff]  ;;  %v30_v61 = vld [vmem:[%s258_s0 + $0x68] sm:$0xff] }
   0x6   :  { %v95_v28 = vsel %vm34_vm1, %v78_v17, 0.0  ;;  %v48_v29 = vsel %vm34_vm1, %v24_v24, 0.0  ;;  %v94_v30 = vadd.f32 %v93_v27, %v92_v26  ;;  %v81_v33 = vmul.f32 %v22_v13, %v22_v13  ;;  %v31_v3 = vld [vmem:[%s258_s0 + $0x70] sm:$0xff] }
   0x7   :  { %v41_v14 = vadd.f32 %v40_v9, %v39_v11  ;;  %v97_v34 = vsel %vm34_vm1, %v79_v21, 0.0  ;;  %v50_v35 = vsel %vm34_vm1, %v25_v31, 0.0  ;;  %v82_v39 = vmul.f32 %v23_v19, %v23_v19  ;;  %v32_v9 = vld [vmem:[%s258_s0 + $0x78] sm:$0xff] }
   0x8   :  { %v96_v36 = vadd.f32 %v95_v28, %v94_v30  ;;  %v99_v40 = vsel %vm34_vm1, %v80_v23, 0.0  ;;  %v52_v41 = vsel %vm34_vm1, %v26_v37, 0.0  ;;  %v83_v45 = vmul.f32 %v24_v24, %v24_v24 }
   0x9   :  { %v43_v20 = vadd.f32 %v42_v12, %v41_v14  ;;  %v101_v46 = vsel %vm34_vm1, %v81_v33, 0.0  ;;  %v54_v47 = vsel %vm34_vm1, %v27_v43, 0.0  ;;  %v84_v51 = vmul.f32 %v25_v31, %v25_v31 }
   0xa   :  { %v98_v42 = vadd.f32 %v97_v34, %v96_v36  ;;  %v103_v52 = vsel %vm34_vm1, %v82_v39, 0.0  ;;  %v56_v53 = vsel %vm34_vm1, %v28_v49, 0.0  ;;  %v85_v57 = vmul.f32 %v26_v37, %v26_v37  ;;  %v33_v36 = vld [vmem:[%s259_s1] sm:$0x1] }
   0xb   :  { %v45_v25 = vadd.f32 %v44_v18, %v43_v20  ;;  %v105_v58 = vsel %vm34_vm1, %v83_v45, 0.0  ;;  %v58_v59 = vsel %vm34_vm1, %v29_v55, 0.0  ;;  %v86_v63 = vmul.f32 %v27_v43, %v27_v43 }
   0xc   :  { %v100_v48 = vadd.f32 %v99_v40, %v98_v42  ;;  %v107_v0 = vsel %vm34_vm1, %v84_v51, 0.0  ;;  %v60_v1 = vsel %vm34_vm1, %v30_v61, 0.0  ;;  %v87_v5 = vmul.f32 %v28_v49, %v28_v49 }
   0xd   :  { %v47_v32 = vadd.f32 %v46_v22, %v45_v25  ;;  %v109_v6 = vsel %vm34_vm1, %v85_v57, 0.0  ;;  %v62_v7 = vsel %vm34_vm1, %v31_v3, 0.0  ;;  %v88_v11 = vmul.f32 %v29_v55, %v29_v55 }
   0xe   :  { %v102_v54 = vadd.f32 %v101_v46, %v100_v48  ;;  %v111_v12 = vsel %vm34_vm1, %v86_v63, 0.0  ;;  %v64_v13 = vsel %vm34_vm1, %v32_v9, 0.0  ;;  %v89_v16 = vmul.f32 %v30_v61, %v30_v61 }
   0xf   :  { %v49_v38 = vadd.f32 %v48_v29, %v47_v32  ;;  %v113_v17 = vsel %vm34_vm1, %v87_v5, 0.0  ;;  %v90_v20 = vmul.f32 %v31_v3, %v31_v3  ;;  %v115_v21 = vsel %vm34_vm1, %v88_v11, 0.0 }
  0x10   :  { %v104_v60 = vadd.f32 %v103_v52, %v102_v54  ;;  %v91_v24 = vmul.f32 %v32_v9, %v32_v9  ;;  %v117_v25 = vsel %vm34_vm1, %v89_v16, 0.0 }
  0x11   :  { %v51_v44 = vadd.f32 %v50_v35, %v49_v38  ;;  %v119_v28 = vsel %vm34_vm1, %v90_v20, 0.0 }
  0x12   :  { %v106_v2 = vadd.f32 %v105_v58, %v104_v60  ;;  %v121_v31 = vsel %vm34_vm1, %v91_v24, 0.0 }
  0x13   :  { %v53_v50 = vadd.f32 %v52_v41, %v51_v44  ;;  %v75_v44 = vld [vmem:[%s260_s2] sm:$0x1] }
  0x14   :  { %v108_v8 = vadd.f32 %v107_v0, %v106_v2 }
  0x15   :  { %v55_v56 = vadd.f32 %v54_v47, %v53_v50 }
  0x16   :  { %v110_v14 = vadd.f32 %v109_v6, %v108_v8 }
  0x17   :  { %v57_v62 = vadd.f32 %v56_v53, %v55_v56 }
  0x18   :  { %v112_v18 = vadd.f32 %v111_v12, %v110_v14 }
  0x19   :  { %v59_v4 = vadd.f32 %v58_v59, %v57_v62 }
  0x1a   :  { %v114_v22 = vadd.f32 %v113_v17, %v112_v18 }
  0x1b   :  { %v61_v10 = vadd.f32 %v60_v1, %v59_v4 }
  0x1c   :  { %v116_v26 = vadd.f32 %v115_v21, %v114_v22 }
  0x1d   :  { %v63_v15 = vadd.f32 %v62_v7, %v61_v10 }
  0x1e   :  { %v118_v29 = vadd.f32 %v117_v25, %v116_v26 }
  0x1f   :  { %v65_v19 = vadd.f32 %v64_v13, %v63_v15 }
  0x20   :  { %v120_v32 = vadd.f32 %v119_v28, %v118_v29 }
  0x21   :  { %v66_v23 = vrot.slane %v65_v19, 4 }
  0x22   :  { %v122_v34 = vadd.f32 %v121_v31, %v120_v32 }
  0x23   :  { %v67_v27 = vadd.f32 %v66_v23, %v65_v19 }
  0x24   :  { %v123_v37 = vrot.slane %v122_v34, 4 }
  0x25   :  { %v68_v30 = vrot.slane %v67_v27, 2 }
  0x26   :  { %v124_v39 = vadd.f32 %v123_v37, %v122_v34 }
  0x27   :  { %v69_v33 = vadd.f32 %v68_v30, %v67_v27 }
  0x28   :  { %v125_v41 = vrot.slane %v124_v39, 2 }
  0x29   :  { %v70_v35 = vrot.slane %v69_v33, 1 }
  0x2a   :  { %v126_v42 = vadd.f32 %v125_v41, %v124_v39 }
  0x2b   :  { %v71_v38 = vadd.f32 %v70_v35, %v69_v33 }
  0x2c   :  { %v127_v43 = vrot.slane %v126_v42, 1 }
  0x2d   :  { %v72_v40 = vadd.f32 %v71_v38, %v33_v36 }
  0x2e   :  { %v128_v45 = vadd.f32 %v127_v43, %v126_v42 }
  0x2f   :  { %74 = vst.msk [vmem:[%s259_s1] sm:$0x1] %vm14_vm0, %v72_v40 }
  0x30   :  { %v129_v46 = vadd.f32 %v128_v45, %v75_v44 }
  0x32   :  { %130 = vst.msk [vmem:[%s260_s2] sm:$0x1] %vm14_vm0, %v129_v46 }

// kernel: residual_block_forward.14
= control target key start
LH: loop header
LB: loop body
LE: loop exit
PB: predicated region body
PF: predicated region fallthrough
CT: control target
= control target key end

     0   :  { %vm70_vm0 = vcmask 64512   ;;  %s231_s0 = inlined_call_operand.vmem [shape: f32[128,8], index: 0, kind: input, shape index: {}]   ;;  %s232_s1 = inlined_call_operand.vmem [shape: f32[1,8], index: 1, kind: input, shape index: {}]   ;;  %s233_s2 = inlined_call_operand.vmem [shape: f32[1,8], index: 2, kind: input, shape index: {}]   ;;  %s234_s3 = inlined_call_operand.vmem [shape: f32[128,8], index: 3, kind: output, shape index: {}]  }
   0x1   :  { %v14_v0 = vld [vmem:[%s231_s0] sm:$0xff]  ;;  %v15_v3 = vld [vmem:[%s231_s0 + $0x8] sm:$0xff]  ;;  %v16_v6 = vld [vmem:[%s231_s0 + $0x10] sm:$0xff] }
   0x2   :  { %v91_v1 = vld [vmem:[%s232_s1] ss:$0 sm:$0xff]  ;;  %v17_v7 = vld [vmem:[%s231_s0 + $0x18] sm:$0xff]  ;;  %v19_v12 = vld [vmem:[%s231_s0 + $0x28] sm:$0xff] }
   0x3   :  { %v92_v2 = vld [vmem:[%s233_s2] ss:$0 sm:$0xff]  ;;  %v34_v4 = vmul.f32 %v91_v1, %v14_v0  ;;  %v35_v5 = vmul.f32 %v91_v1, %v15_v3  ;;  %v36_v9 = vmul.f32 %v91_v1, %v16_v6  ;;  %v37_v10 = vmul.f32 %v91_v1, %v17_v7  ;;  %v20_v13 = vld [vmem:[%s231_s0 + $0x30] sm:$0xff]  ;;  %v21_v14 = vld [vmem:[%s231_s0 + $0x38] sm:$0xff] }
   0x4   :  { %v18_v8 = vld [vmem:[%s231_s0 + $0x20] sm:$0xff]  ;;  %v39_v17 = vmul.f32 %v91_v1, %v19_v12  ;;  %v40_v18 = vmul.f32 %v91_v1, %v20_v13  ;;  %v23_v20 = vld [vmem:[%s231_s0 + $0x48] sm:$0xff]  ;;  %v41_v23 = vmul.f32 %v91_v1, %v21_v14  ;;  %v24_v24 = vld [vmem:[%s231_s0 + $0x50] sm:$0xff] }
   0x5   :  { %v38_v11 = vmul.f32 %v91_v1, %v18_v8  ;;  %v54_v15 = vadd.f32 %v92_v2, %v34_v4  ;;  %v55_v16 = vadd.f32 %v92_v2, %v35_v5  ;;  %v22_v19 = vld [vmem:[%s231_s0 + $0x40] sm:$0xff]  ;;  %v56_v21 = vadd.f32 %v92_v2, %v36_v9  ;;  %v25_v27 = vld [vmem:[%s231_s0 + $0x58] sm:$0xff]  ;;  %v27_v33 = vld [vmem:[%s231_s0 + $0x68] sm:$0xff] }
   0x6   :  { %v57_v22 = vadd.f32 %v92_v2, %v37_v10  ;;  %v42_v26 = vmul.f32 %v91_v1, %v22_v19  ;;  %v59_v28 = vadd.f32 %v92_v2, %v39_v17  ;;  %v43_v29 = vmul.f32 %v91_v1, %v23_v20  ;;  %v26_v30 = vld [vmem:[%s231_s0 + $0x60] sm:$0xff]  ;;  %v28_v36 = vld [vmem:[%s231_s0 + $0x70] sm:$0xff]  ;;  %v29_v39 = vld [vmem:[%s231_s0 + $0x78] sm:$0xff] }
   0x7   :  { %71 = vst.msk [vmem:[%s234_s3] sm:$0xff] %vm70_vm0, %v54_v15  ;;  %v58_v25 = vadd.f32 %v92_v2, %v38_v11  ;;  %v60_v31 = vadd.f32 %v92_v2, %v40_v18  ;;  %v44_v32 = vmul.f32 %v91_v1, %v24_v24  ;;  %v61_v34 = vadd.f32 %v92_v2, %v41_v23 }
   0x8   :  { %72 = vst.msk [vmem:[%s234_s3 + $0x8] sm:$0xff] %vm70_vm0, %v55_v16  ;;  %v45_v35 = vmul.f32 %v91_v1, %v25_v27  ;;  %v62_v37 = vadd.f32 %v92_v2, %v42_v26  ;;  %v46_v38 = vmul.f32 %v91_v1, %v26_v30  ;;  %v63_v40 = vadd.f32 %v92_v2, %v43_v29 }
   0x9   :  { %73 = vst.msk [vmem:[%s234_s3 + $0x10] sm:$0xff] %vm70_vm0, %v56_v21  ;;  %v47_v41 = vmul.f32 %v91_v1, %v27_v33  ;;  %v64_v42 = vadd.f32 %v92_v2, %v44_v32  ;;  %v48_v43 = vmul.f32 %v91_v1, %v28_v36  ;;  %v49_v45 = vmul.f32 %v91_v1, %v29_v39 }
   0xa   :  { %74 = vst.msk [vmem:[%s234_s3 + $0x18] sm:$0xff] %vm70_vm0, %v57_v22  ;;  %v65_v44 = vadd.f32 %v92_v2, %v45_v35  ;;  %v66_v46 = vadd.f32 %v92_v2, %v46_v38 }
   0xb   :  { %75 = vst.msk [vmem:[%s234_s3 + $0x20] sm:$0xff] %vm70_vm0, %v58_v25  ;;  %v67_v47 = vadd.f32 %v92_v2, %v47_v41  ;;  %v68_v48 = vadd.f32 %v92_v2, %v48_v43  ;;  %v69_v49 = vadd.f32 %v92_v2, %v49_v45 }
   0xc   :  { %76 = vst.msk [vmem:[%s234_s3 + $0x28] sm:$0xff] %vm70_vm0, %v59_v28 }
   0xd   :  { %77 = vst.msk [vmem:[%s234_s3 + $0x30] sm:$0xff] %vm70_vm0, %v60_v31 }
   0xe   :  { %78 = vst.msk [vmem:[%s234_s3 + $0x38] sm:$0xff] %vm70_vm0, %v61_v34 }
   0xf   :  { %79 = vst.msk [vmem:[%s234_s3 + $0x40] sm:$0xff] %vm70_vm0, %v62_v37 }
  0x10   :  { %80 = vst.msk [vmem:[%s234_s3 + $0x48] sm:$0xff] %vm70_vm0, %v63_v40 }
  0x11   :  { %81 = vst.msk [vmem:[%s234_s3 + $0x50] sm:$0xff] %vm70_vm0, %v64_v42 }
  0x12   :  { %82 = vst.msk [vmem:[%s234_s3 + $0x58] sm:$0xff] %vm70_vm0, %v65_v44 }
  0x13   :  { %83 = vst.msk [vmem:[%s234_s3 + $0x60] sm:$0xff] %vm70_vm0, %v66_v46 }
  0x14   :  { %84 = vst.msk [vmem:[%s234_s3 + $0x68] sm:$0xff] %vm70_vm0, %v67_v47 }
  0x15   :  { %85 = vst.msk [vmem:[%s234_s3 + $0x70] sm:$0xff] %vm70_vm0, %v68_v48 }
  0x16   :  { %86 = vst.msk [vmem:[%s234_s3 + $0x78] sm:$0xff] %vm70_vm0, %v69_v49 }

// kernel: residual_block_forward.12
= control target key start
LH: loop header
LB: loop body
LE: loop exit
PB: predicated region body
PF: predicated region fallthrough
CT: control target
= control target key end

     0   :  { %vm150_vm0 = vcmask 1041408   ;;  %vm16_vm1 = vcmask 64512   ;;  %v308_v3 = vmov 0.0   ;;  %vm125_vm2 = vcmask 293888   ;;  %s541_s1 = inlined_call_operand.vmem [shape: bf16[36,8], index: 1, kind: input, shape index: {}]   ;;  %s542_s2 = inlined_call_operand.vmem [shape: f32[128,8], index: 2, kind: output, shape index: {}]   ;;  %s543_s0 = inlined_call_operand.vmem [shape: bf16[128,36], index: 0, kind: input, shape index: {}]  }
   0x1   :  { %v69_v0 = vld [vmem:[%s541_s1 + $0x10] sm:$0x3]  ;;  %17 = vst.msk [vmem:[%s542_s2] sm:$0xff] %vm16_vm1, %v308_v3  ;;  %v297_v5 = vld [vmem:[%s541_s1 + $0x8] sm:$0xff]  ;;  %v296_v6 = vld [vmem:[%s541_s1] sm:$0xff] }
   0x2   :  { %v119_v1 = vunpack.c.l.b16 %v69_v0  ;;  %18 = vst.msk [vmem:[%s542_s2 + $0x8] sm:$0xff] %vm16_vm1, %v308_v3  ;;  %v288_v7 = vld [vmem:[%s543_s0] sm:$0xff]  ;;  %v290_v8 = vld [vmem:[%s543_s0 + $0x10] sm:$0xff]  ;;  %v289_v11 = vld [vmem:[%s543_s0 + $0x8] sm:$0xff] }
   0x3   :  { %19 = vst.msk [vmem:[%s542_s2 + $0x10] sm:$0xff] %vm16_vm1, %v308_v3  ;;  %v292_v9 = vld [vmem:[%s543_s0 + $0x20] sm:$0xff]  ;;  %v294_v10 = vld [vmem:[%s543_s0 + $0x30] sm:$0xff]  ;;  %v291_v12 = vld [vmem:[%s543_s0 + $0x18] sm:$0xff] }
   0x4   :  { %v122_v2 = vpack.c.b16 %v119_v1, %v119_v1  ;;  %20 = vst.msk [vmem:[%s542_s2 + $0x18] sm:$0xff] %vm16_vm1, %v308_v3  ;;  %v293_v13 = vld [vmem:[%s543_s0 + $0x28] sm:$0xff]  ;;  %v295_v14 = vld [vmem:[%s543_s0 + $0x38] sm:$0xff] }
   0x5   :  { %21 = vst.msk [vmem:[%s542_s2 + $0x20] sm:$0xff] %vm16_vm1, %v308_v3 }
   0x6   :  { %v152_v4 = vsel %vm150_vm0, %v122_v2, 0  ;;  %22 = vst.msk [vmem:[%s542_s2 + $0x28] sm:$0xff] %vm16_vm1, %v308_v3 }
   0x7   :  { %159 = vmatpush.bf16.msra.mxu0 %v152_v4  ;;  %298 = vmatpush.bf16.msra.mxu1 %v152_v4  ;;  %23 = vst.msk [vmem:[%s542_s2 + $0x30] sm:$0xff] %vm16_vm1, %v308_v3 }
   0x8   :  { %299 = vmatpush.bf16.msra.mxu2 %v152_v4  ;;  %300 = vmatpush.bf16.msra.mxu3 %v152_v4  ;;  %24 = vst.msk [vmem:[%s542_s2 + $0x38] sm:$0xff] %vm16_vm1, %v308_v3  ;;  %v33_v15 = vld [vmem:[%s542_s2] sm:$0xff] }
   0x9   :  { %25 = vst.msk [vmem:[%s542_s2 + $0x40] sm:$0xff] %vm16_vm1, %v308_v3  ;;  %v34_v23 = vld [vmem:[%s542_s2 + $0x8] sm:$0xff] }
   0xa   :  { %26 = vst.msk [vmem:[%s542_s2 + $0x48] sm:$0xff] %vm16_vm1, %v308_v3  ;;  %v35_v35 = vld [vmem:[%s542_s2 + $0x10] sm:$0xff] }
   0xb   :  { %160 = vmatpush.bf16.msra.mxu0 %v297_v5  ;;  %301 = vmatpush.bf16.msra.mxu1 %v297_v5  ;;  %27 = vst.msk [vmem:[%s542_s2 + $0x50] sm:$0xff] %vm16_vm1, %v308_v3  ;;  %v36_v47 = vld [vmem:[%s542_s2 + $0x18] sm:$0xff] }
   0xc   :  { %302 = vmatpush.bf16.msra.mxu2 %v297_v5  ;;  %303 = vmatpush.bf16.msra.mxu3 %v297_v5  ;;  %28 = vst.msk [vmem:[%s542_s2 + $0x58] sm:$0xff] %vm16_vm1, %v308_v3  ;;  %v37_v16 = vld [vmem:[%s542_s2 + $0x20] sm:$0xff] }
   0xd   :  { %29 = vst.msk [vmem:[%s542_s2 + $0x60] sm:$0xff] %vm16_vm1, %v308_v3  ;;  %v38_v24 = vld [vmem:[%s542_s2 + $0x28] sm:$0xff] }
   0xe   :  { %30 = vst.msk [vmem:[%s542_s2 + $0x68] sm:$0xff] %vm16_vm1, %v308_v3  ;;  %v39_v36 = vld [vmem:[%s542_s2 + $0x30] sm:$0xff] }
   0xf   :  { %161 = vmatpush.bf16.msra.mxu0 %v296_v6  ;;  %304 = vmatpush.bf16.msra.mxu1 %v296_v6  ;;  %31 = vst.msk [vmem:[%s542_s2 + $0x70] sm:$0xff] %vm16_vm1, %v308_v3  ;;  %v40_v48 = vld [vmem:[%s542_s2 + $0x38] sm:$0xff] }
  0x10   :  { %305 = vmatpush.bf16.msra.mxu2 %v296_v6  ;;  %306 = vmatpush.bf16.msra.mxu3 %v296_v6  ;;  %32 = vst.msk [vmem:[%s542_s2 + $0x78] sm:$0xff] %vm16_vm1, %v308_v3  ;;  %v41_v21 = vld [vmem:[%s542_s2 + $0x40] sm:$0xff] }
  0x11   :  { %v42_v33 = vld [vmem:[%s542_s2 + $0x48] sm:$0xff] }
  0x12   :  { %280 = vmatmul.msk.bf16.vlgmr.msra.gmra.mxu0 %vm125_vm2, %v288_v7  ;;  %282 = vmatmul.msk.bf16.vlgmr.msra.gmra.mxu1 %vm125_vm2, %v290_v8  ;;  %v43_v45 = vld [vmem:[%s542_s2 + $0x50] sm:$0xff] }
  0x13   :  { %284 = vmatmul.msk.bf16.vlgmr.msra.gmra.mxu2 %vm125_vm2, %v292_v9  ;;  %286 = vmatmul.msk.bf16.vlgmr.msra.gmra.mxu3 %vm125_vm2, %v294_v10  ;;  %v44_v57 = vld [vmem:[%s542_s2 + $0x58] sm:$0xff] }
  0x14   :  { %v45_v22 = vld [vmem:[%s542_s2 + $0x60] sm:$0xff] }
  0x15   :  { %v46_v34 = vld [vmem:[%s542_s2 + $0x68] sm:$0xff] }
  0x16   :  { %v47_v46 = vld [vmem:[%s542_s2 + $0x70] sm:$0xff] }
  0x17   :  { %v48_v58 = vld [vmem:[%s542_s2 + $0x78] sm:$0xff] }
  0x22   :  { %281 = vmatmul.msk.bf16.gmra.mxu0 %vm125_vm2, %v289_v11  ;;  %283 = vmatmul.msk.bf16.gmra.mxu1 %vm125_vm2, %v291_v12 }
  0x23   :  { %285 = vmatmul.msk.bf16.gmra.mxu2 %vm125_vm2, %v293_v13  ;;  %287 = vmatmul.msk.bf16.gmra.mxu3 %vm125_vm2, %v295_v14 }
  0x8f   :  { %v163_v17 = vpop.f32.mrf.mxu0  ;;  %v173_v18 = vpop.f32.mrf.mxu1 }
  0x90   :  { %v203_v19 = vadd.f32 %v163_v17, %v33_v15  ;;  %v207_v20 = vadd.f32 %v173_v18, %v37_v16 }
  0x92   :  { %220 = vst.msk [vmem:[%s542_s2] sm:$0xff] %vm16_vm1, %v203_v19 }
  0x93   :  { %224 = vst.msk [vmem:[%s542_s2 + $0x20] sm:$0xff] %vm16_vm1, %v207_v20 }
  0x96   :  { %v183_v25 = vpop.f32.mrf.mxu2  ;;  %v193_v26 = vpop.f32.mrf.mxu3 }
  0x97   :  { %v211_v27 = vadd.f32 %v183_v25, %v41_v21  ;;  %v215_v28 = vadd.f32 %v193_v26, %v45_v22  ;;  %v165_v29 = vpop.f32.mrf.mxu0  ;;  %v175_v30 = vpop.f32.mrf.mxu1 }
  0x98   :  { %v204_v31 = vadd.f32 %v165_v29, %v34_v23  ;;  %v208_v32 = vadd.f32 %v175_v30, %v38_v24 }
  0x99   :  { %228 = vst.msk [vmem:[%s542_s2 + $0x40] sm:$0xff] %vm16_vm1, %v211_v27 }
  0x9a   :  { %232 = vst.msk [vmem:[%s542_s2 + $0x60] sm:$0xff] %vm16_vm1, %v215_v28 }
  0x9b   :  { %221 = vst.msk [vmem:[%s542_s2 + $0x8] sm:$0xff] %vm16_vm1, %v204_v31 }
  0x9c   :  { %225 = vst.msk [vmem:[%s542_s2 + $0x28] sm:$0xff] %vm16_vm1, %v208_v32 }
  0x9e   :  { %v185_v37 = vpop.f32.mrf.mxu2  ;;  %v195_v38 = vpop.f32.mrf.mxu3 }
  0x9f   :  { %v212_v39 = vadd.f32 %v185_v37, %v42_v33  ;;  %v216_v40 = vadd.f32 %v195_v38, %v46_v34  ;;  %v168_v41 = vpop.f32.mrf.mxu0  ;;  %v178_v42 = vpop.f32.mrf.mxu1 }
  0xa0   :  { %v205_v43 = vadd.f32 %v168_v41, %v35_v35  ;;  %v209_v44 = vadd.f32 %v178_v42, %v39_v36 }
  0xa1   :  { %229 = vst.msk [vmem:[%s542_s2 + $0x48] sm:$0xff] %vm16_vm1, %v212_v39 }
  0xa2   :  { %233 = vst.msk [vmem:[%s542_s2 + $0x68] sm:$0xff] %vm16_vm1, %v216_v40 }
  0xa3   :  { %222 = vst.msk [vmem:[%s542_s2 + $0x10] sm:$0xff] %vm16_vm1, %v205_v43 }
  0xa4   :  { %226 = vst.msk [vmem:[%s542_s2 + $0x30] sm:$0xff] %vm16_vm1, %v209_v44 }
  0xa6   :  { %v188_v49 = vpop.f32.mrf.mxu2  ;;  %v198_v50 = vpop.f32.mrf.mxu3 }
  0xa7   :  { %v213_v51 = vadd.f32 %v188_v49, %v43_v45  ;;  %v217_v52 = vadd.f32 %v198_v50, %v47_v46  ;;  %v170_v53 = vpop.f32.mrf.mxu0  ;;  %v180_v54 = vpop.f32.mrf.mxu1 }
  0xa8   :  { %v206_v55 = vadd.f32 %v170_v53, %v36_v47  ;;  %v210_v56 = vadd.f32 %v180_v54, %v40_v48 }
  0xa9   :  { %230 = vst.msk [vmem:[%s542_s2 + $0x50] sm:$0xff] %vm16_vm1, %v213_v51 }
  0xaa   :  { %234 = vst.msk [vmem:[%s542_s2 + $0x70] sm:$0xff] %vm16_vm1, %v217_v52 }
  0xab   :  { %223 = vst.msk [vmem:[%s542_s2 + $0x18] sm:$0xff] %vm16_vm1, %v206_v55 }
  0xac   :  { %227 = vst.msk [vmem:[%s542_s2 + $0x38] sm:$0xff] %vm16_vm1, %v210_v56 }
  0xae   :  { %v190_v59 = vpop.f32.mrf.mxu2  ;;  %v200_v60 = vpop.f32.mrf.mxu3 }
  0xaf   :  { %v214_v61 = vadd.f32 %v190_v59, %v44_v57  ;;  %v218_v62 = vadd.f32 %v200_v60, %v48_v58 }
  0xb1   :  { %231 = vst.msk [vmem:[%s542_s2 + $0x58] sm:$0xff] %vm16_vm1, %v214_v61 }
  0xb2   :  { %235 = vst.msk [vmem:[%s542_s2 + $0x78] sm:$0xff] %vm16_vm1, %v218_v62 }

// kernel: residual_block_forward.11
= control target key start
LH: loop header
LB: loop body
LE: loop exit
PB: predicated region body
PF: predicated region fallthrough
CT: control target
= control target key end

     0   :  { %vm86_vm0 = vcmask 64512   ;;  %s265_s0 = inlined_call_operand.vmem [shape: f32[128,8], index: 0, kind: input, shape index: {}]   ;;  %s266_s1 = inlined_call_operand.vmem [shape: f32[1,8], index: 1, kind: input, shape index: {}]   ;;  %s267_s2 = inlined_call_operand.vmem [shape: f32[1,8], index: 2, kind: input, shape index: {}]   ;;  %s268_s3 = inlined_call_operand.vmem [shape: f32[128,8], index: 3, kind: output, shape index: {}]  }
   0x1   :  { %v14_v0 = vld [vmem:[%s265_s0] sm:$0xff]  ;;  %v15_v3 = vld [vmem:[%s265_s0 + $0x8] sm:$0xff]  ;;  %v16_v6 = vld [vmem:[%s265_s0 + $0x10] sm:$0xff] }
   0x2   :  { %v107_v1 = vld [vmem:[%s266_s1] ss:$0 sm:$0xff]  ;;  %v17_v7 = vld [vmem:[%s265_s0 + $0x18] sm:$0xff]  ;;  %v19_v12 = vld [vmem:[%s265_s0 + $0x28] sm:$0xff] }
   0x3   :  { %v138_v2 = vld [vmem:[%s267_s2] ss:$0 sm:$0xff]  ;;  %v34_v4 = vmul.f32 %v107_v1, %v14_v0  ;;  %v35_v5 = vmul.f32 %v107_v1, %v15_v3  ;;  %v36_v9 = vmul.f32 %v107_v1, %v16_v6  ;;  %v37_v10 = vmul.f32 %v107_v1, %v17_v7  ;;  %v20_v13 = vld [vmem:[%s265_s0 + $0x30] sm:$0xff]  ;;  %v21_v14 = vld [vmem:[%s265_s0 + $0x38] sm:$0xff] }
   0x4   :  { %v18_v8 = vld [vmem:[%s265_s0 + $0x20] sm:$0xff]  ;;  %v39_v17 = vmul.f32 %v107_v1, %v19_v12  ;;  %v40_v18 = vmul.f32 %v107_v1, %v20_v13  ;;  %v41_v22 = vmul.f32 %v107_v1, %v21_v14  ;;  %v23_v24 = vld [vmem:[%s265_s0 + $0x48] sm:$0xff]  ;;  %v24_v29 = vld [vmem:[%s265_s0 + $0x50] sm:$0xff] }
   0x5   :  { %v38_v11 = vmul.f32 %v107_v1, %v18_v8  ;;  %v54_v15 = vadd.f32 %v138_v2, %v34_v4  ;;  %v55_v16 = vadd.f32 %v138_v2, %v35_v5  ;;  %v56_v19 = vadd.f32 %v138_v2, %v36_v9  ;;  %v22_v23 = vld [vmem:[%s265_s0 + $0x40] sm:$0xff]  ;;  %v25_v30 = vld [vmem:[%s265_s0 + $0x58] sm:$0xff]  ;;  %v27_v35 = vld [vmem:[%s265_s0 + $0x68] sm:$0xff] }
   0x6   :  { %v57_v20 = vadd.f32 %v138_v2, %v37_v10  ;;  %v59_v27 = vadd.f32 %v138_v2, %v39_v17  ;;  %v60_v28 = vadd.f32 %v138_v2, %v40_v18  ;;  %v26_v31 = vld [vmem:[%s265_s0 + $0x60] sm:$0xff]  ;;  %v61_v34 = vadd.f32 %v138_v2, %v41_v22  ;;  %v28_v36 = vld [vmem:[%s265_s0 + $0x70] sm:$0xff]  ;;  %v29_v41 = vld [vmem:[%s265_s0 + $0x78] sm:$0xff] }
   0x7   :  { %v58_v21 = vadd.f32 %v138_v2, %v38_v11  ;;  %v70_v25 = vmax.f32 %v54_v15, 0.0  ;;  %v71_v26 = vmax.f32 %v55_v16, 0.0  ;;  %v72_v32 = vmax.f32 %v56_v19, 0.0 }
   0x8   :  { %v73_v33 = vmax.f32 %v57_v20, 0.0  ;;  %v75_v38 = vmax.f32 %v59_v27, 0.0  ;;  %v42_v39 = vmul.f32 %v107_v1, %v22_v23  ;;  %v43_v40 = vmul.f32 %v107_v1, %v23_v24 }
   0x9   :  { %87 = vst.msk [vmem:[%s268_s3] sm:$0xff] %vm86_vm0, %v70_v25  ;;  %v74_v37 = vmax.f32 %v58_v21, 0.0  ;;  %v76_v42 = vmax.f32 %v60_v28, 0.0  ;;  %v44_v43 = vmul.f32 %v107_v1, %v24_v29  ;;  %v45_v44 = vmul.f32 %v107_v1, %v25_v30 }
   0xa   :  { %88 = vst.msk [vmem:[%s268_s3 + $0x8] sm:$0xff] %vm86_vm0, %v71_v26  ;;  %v46_v45 = vmul.f32 %v107_v1, %v26_v31  ;;  %v62_v46 = vadd.f32 %v138_v2, %v42_v39  ;;  %v63_v47 = vadd.f32 %v138_v2, %v43_v40  ;;  %v47_v48 = vmul.f32 %v107_v1, %v27_v35 }
   0xb   :  { %89 = vst.msk [vmem:[%s268_s3 + $0x10] sm:$0xff] %vm86_vm0, %v72_v32  ;;  %v48_v49 = vmul.f32 %v107_v1, %v28_v36  ;;  %v77_v50 = vmax.f32 %v61_v34, 0.0  ;;  %v64_v51 = vadd.f32 %v138_v2, %v44_v43  ;;  %v65_v52 = vadd.f32 %v138_v2, %v45_v44 }
   0xc   :  { %90 = vst.msk [vmem:[%s268_s3 + $0x18] sm:$0xff] %vm86_vm0, %v73_v33  ;;  %v49_v53 = vmul.f32 %v107_v1, %v29_v41  ;;  %v78_v54 = vmax.f32 %v62_v46, 0.0  ;;  %v66_v55 = vadd.f32 %v138_v2, %v46_v45  ;;  %v79_v56 = vmax.f32 %v63_v47, 0.0 }
   0xd   :  { %91 = vst.msk [vmem:[%s268_s3 + $0x20] sm:$0xff] %vm86_vm0, %v74_v37  ;;  %v67_v57 = vadd.f32 %v138_v2, %v47_v48  ;;  %v80_v58 = vmax.f32 %v64_v51, 0.0  ;;  %v68_v59 = vadd.f32 %v138_v2, %v48_v49  ;;  %v81_v60 = vmax.f32 %v65_v52, 0.0 }
   0xe   :  { %92 = vst.msk [vmem:[%s268_s3 + $0x28] sm:$0xff] %vm86_vm0, %v75_v38  ;;  %v69_v61 = vadd.f32 %v138_v2, %v49_v53  ;;  %v82_v62 = vmax.f32 %v66_v55, 0.0 }
   0xf   :  { %93 = vst.msk [vmem:[%s268_s3 + $0x30] sm:$0xff] %vm86_vm0, %v76_v42  ;;  %v83_v63 = vmax.f32 %v67_v57, 0.0  ;;  %v84_v0 = vmax.f32 %v68_v59, 0.0 }
  0x10   :  { %94 = vst.msk [vmem:[%s268_s3 + $0x38] sm:$0xff] %vm86_vm0, %v77_v50  ;;  %v85_v1 = vmax.f32 %v69_v61, 0.0 }
  0x11   :  { %95 = vst.msk [vmem:[%s268_s3 + $0x40] sm:$0xff] %vm86_vm0, %v78_v54 }
  0x12   :  { %96 = vst.msk [vmem:[%s268_s3 + $0x48] sm:$0xff] %vm86_vm0, %v79_v56 }
  0x13   :  { %97 = vst.msk [vmem:[%s268_s3 + $0x50] sm:$0xff] %vm86_vm0, %v80_v58 }
  0x14   :  { %98 = vst.msk [vmem:[%s268_s3 + $0x58] sm:$0xff] %vm86_vm0, %v81_v60 }
  0x15   :  { %99 = vst.msk [vmem:[%s268_s3 + $0x60] sm:$0xff] %vm86_vm0, %v82_v62 }
  0x16   :  { %100 = vst.msk [vmem:[%s268_s3 + $0x68] sm:$0xff] %vm86_vm0, %v83_v63 }
  0x17   :  { %101 = vst.msk [vmem:[%s268_s3 + $0x70] sm:$0xff] %vm86_vm0, %v84_v0 }
  0x18   :  { %102 = vst.msk [vmem:[%s268_s3 + $0x78] sm:$0xff] %vm86_vm0, %v85_v1 }

// kernel: residual_block_forward.15
= control target key start
LH: loop header
LB: loop body
LE: loop exit
PB: predicated region body
PF: predicated region fallthrough
CT: control target
= control target key end

     0   :  { %vm166_vm0 = vcmask 1043456   ;;  %vm16_vm1 = vcmask 64512   ;;  %v340_v6 = vmov 0.0   ;;  %vm141_vm2 = vcmask 588800   ;;  %s579_s1 = inlined_call_operand.vmem [shape: bf16[72,8], index: 1, kind: input, shape index: {}]   ;;  %s580_s2 = inlined_call_operand.vmem [shape: f32[128,8], index: 2, kind: output, shape index: {}]   ;;  %s581_s0 = inlined_call_operand.vmem [shape: bf16[128,72], index: 0, kind: input, shape index: {}]  }
   0x1   :  { %v73_v0 = vld [vmem:[%s579_s1 + $0x20] sm:$0xf]  ;;  %v323_v4 = vld [vmem:[%s579_s1 + $0x18] sm:$0xff]  ;;  %v322_v5 = vld [vmem:[%s579_s1 + $0x10] sm:$0xff]  ;;  %17 = vst.msk [vmem:[%s580_s2] sm:$0xff] %vm16_vm1, %v340_v6 }
   0x2   :  { %v131_v1 = vunpack.c.l.b16 %v73_v0  ;;  %18 = vst.msk [vmem:[%s580_s2 + $0x8] sm:$0xff] %vm16_vm1, %v340_v6  ;;  %v321_v7 = vld [vmem:[%s579_s1 + $0x8] sm:$0xff]  ;;  %v320_v8 = vld [vmem:[%s579_s1] sm:$0xff]  ;;  %v314_v10 = vld [vmem:[%s581_s0 + $0x10] sm:$0xff] }
   0x3   :  { %19 = vst.msk [vmem:[%s580_s2 + $0x10] sm:$0xff] %vm16_vm1, %v340_v6  ;;  %v312_v9 = vld [vmem:[%s581_s0] sm:$0xff]  ;;  %v318_v12 = vld [vmem:[%s581_s0 + $0x30] sm:$0xff]  ;;  %v313_v13 = vld [vmem:[%s581_s0 + $0x8] sm:$0xff] }
   0x4   :  { %v136_v2 = vpack.c.b16 %v131_v1, %v131_v1  ;;  %20 = vst.msk [vmem:[%s580_s2 + $0x18] sm:$0xff] %vm16_vm1, %v340_v6  ;;  %v316_v11 = vld [vmem:[%s581_s0 + $0x20] sm:$0xff]  ;;  %v315_v14 = vld [vmem:[%s581_s0 + $0x18] sm:$0xff]  ;;  %v317_v15 = vld [vmem:[%s581_s0 + $0x28] sm:$0xff] }
   0x5   :  { %21 = vst.msk [vmem:[%s580_s2 + $0x20] sm:$0xff] %vm16_vm1, %v340_v6  ;;  %v319_v16 = vld [vmem:[%s581_s0 + $0x38] sm:$0xff] }
   0x6   :  { %v168_v3 = vsel %vm166_vm0, %v136_v2, 0  ;;  %22 = vst.msk [vmem:[%s580_s2 + $0x28] sm:$0xff] %vm16_vm1, %v340_v6 }
   0x7   :  { %173 = vmatpush.bf16.msra.mxu0 %v168_v3  ;;  %324 = vmatpush.bf16.msra.mxu1 %v168_v3  ;;  %23 = vst.msk [vmem:[%s580_s2 + $0x30] sm:$0xff] %vm16_vm1, %v340_v6 }
   0x8   :  { %325 = vmatpush.bf16.msra.mxu2 %v168_v3  ;;  %326 = vmatpush.bf16.msra.mxu3 %v168_v3  ;;  %24 = vst.msk [vmem:[%s580_s2 + $0x38] sm:$0xff] %vm16_vm1, %v340_v6  ;;  %v33_v17 = vld [vmem:[%s580_s2] sm:$0xff] }
   0x9   :  { %25 = vst.msk [vmem:[%s580_s2 + $0x40] sm:$0xff] %vm16_vm1, %v340_v6  ;;  %v34_v25 = vld [vmem:[%s580_s2 + $0x8] sm:$0xff] }
   0xa   :  { %26 = vst.msk [vmem:[%s580_s2 + $0x48] sm:$0xff] %vm16_vm1, %v340_v6  ;;  %v35_v37 = vld [vmem:[%s580_s2 + $0x10] sm:$0xff] }
   0xb   :  { %174 = vmatpush.bf16.msra.mxu0 %v323_v4  ;;  %327 = vmatpush.bf16.msra.mxu1 %v323_v4  ;;  %27 = vst.msk [vmem:[%s580_s2 + $0x50] sm:$0xff] %vm16_vm1, %v340_v6  ;;  %v36_v49 = vld [vmem:[%s580_s2 + $0x18] sm:$0xff] }
   0xc   :  { %328 = vmatpush.bf16.msra.mxu2 %v323_v4  ;;  %329 = vmatpush.bf16.msra.mxu3 %v323_v4  ;;  %28 = vst.msk [vmem:[%s580_s2 + $0x58] sm:$0xff] %vm16_vm1, %v340_v6  ;;  %v37_v18 = vld [vmem:[%s580_s2 + $0x20] sm:$0xff] }
   0xd   :  { %29 = vst.msk [vmem:[%s580_s2 + $0x60] sm:$0xff] %vm16_vm1, %v340_v6  ;;  %v38_v26 = vld [vmem:[%s580_s2 + $0x28] sm:$0xff] }
   0xe   :  { %30 = vst.msk [vmem:[%s580_s2 + $0x68] sm:$0xff] %vm16_vm1, %v340_v6  ;;  %v39_v38 = vld [vmem:[%s580_s2 + $0x30] sm:$0xff] }
   0xf   :  { %175 = vmatpush.bf16.msra.mxu0 %v322_v5  ;;  %330 = vmatpush.bf16.msra.mxu1 %v322_v5  ;;  %31 = vst.msk [vmem:[%s580_s2 + $0x70] sm:$0xff] %vm16_vm1, %v340_v6  ;;  %v40_v50 = vld [vmem:[%s580_s2 + $0x38] sm:$0xff] }
  0x10   :  { %331 = vmatpush.bf16.msra.mxu2 %v322_v5  ;;  %332 = vmatpush.bf16.msra.mxu3 %v322_v5  ;;  %32 = vst.msk [vmem:[%s580_s2 + $0x78] sm:$0xff] %vm16_vm1, %v340_v6  ;;  %v41_v23 = vld [vmem:[%s580_s2 + $0x40] sm:$0xff] }
  0x11   :  { %v42_v35 = vld [vmem:[%s580_s2 + $0x48] sm:$0xff] }
  0x12   :  { %v43_v47 = vld [vmem:[%s580_s2 + $0x50] sm:$0xff] }
  0x13   :  { %176 = vmatpush.bf16.msra.mxu0 %v321_v7  ;;  %333 = vmatpush.bf16.msra.mxu1 %v321_v7  ;;  %v44_v59 = vld [vmem:[%s580_s2 + $0x58] sm:$0xff] }
  0x14   :  { %334 = vmatpush.bf16.msra.mxu2 %v321_v7  ;;  %335 = vmatpush.bf16.msra.mxu3 %v321_v7  ;;  %v45_v24 = vld [vmem:[%s580_s2 + $0x60] sm:$0xff] }
  0x15   :  { %v46_v36 = vld [vmem:[%s580_s2 + $0x68] sm:$0xff] }
  0x16   :  { %v47_v48 = vld [vmem:[%s580_s2 + $0x70] sm:$0xff] }
  0x17   :  { %177 = vmatpush.bf16.msra.mxu0 %v320_v8  ;;  %336 = vmatpush.bf16.msra.mxu1 %v320_v8  ;;  %v48_v60 = vld [vmem:[%s580_s2 + $0x78] sm:$0xff] }
  0x18   :  { %337 = vmatpush.bf16.msra.mxu2 %v320_v8  ;;  %338 = vmatpush.bf16.msra.mxu3 %v320_v8 }
  0x1a   :  { %304 = vmatmul.msk.bf16.vlgmr.msra.gmra.mxu0 %vm141_vm2, %v312_v9  ;;  %306 = vmatmul.msk.bf16.vlgmr.msra.gmra.mxu1 %vm141_vm2, %v314_v10 }
  0x1b   :  { %308 = vmatmul.msk.bf16.vlgmr.msra.gmra.mxu2 %vm141_vm2, %v316_v11  ;;  %310 = vmatmul.msk.bf16.vlgmr.msra.gmra.mxu3 %vm141_vm2, %v318_v12 }
  0x2a   :  { %305 = vmatmul.msk.bf16.gmra.mxu0 %vm141_vm2, %v313_v13  ;;  %307 = vmatmul.msk.bf16.gmra.mxu1 %vm141_vm2, %v315_v14 }
  0x2b   :  { %309 = vmatmul.msk.bf16.gmra.mxu2 %vm141_vm2, %v317_v15  ;;  %311 = vmatmul.msk.bf16.gmra.mxu3 %vm141_vm2, %v319_v16 }
  0x97   :  { %v179_v19 = vpop.f32.mrf.mxu0  ;;  %v189_v20 = vpop.f32.mrf.mxu1 }
  0x98   :  { %v219_v21 = vadd.f32 %v179_v19, %v33_v17  ;;  %v223_v22 = vadd.f32 %v189_v20, %v37_v18 }
  0x9a   :  { %236 = vst.msk [vmem:[%s580_s2] sm:$0xff] %vm16_vm1, %v219_v21 }
  0x9b   :  { %240 = vst.msk [vmem:[%s580_s2 + $0x20] sm:$0xff] %vm16_vm1, %v223_v22 }
  0x9e   :  { %v199_v27 = vpop.f32.mrf.mxu2  ;;  %v209_v28 = vpop.f32.mrf.mxu3 }
  0x9f   :  { %v227_v29 = vadd.f32 %v199_v27, %v41_v23  ;;  %v231_v30 = vadd.f32 %v209_v28, %v45_v24  ;;  %v181_v31 = vpop.f32.mrf.mxu0  ;;  %v191_v32 = vpop.f32.mrf.mxu1 }
  0xa0   :  { %v220_v33 = vadd.f32 %v181_v31, %v34_v25  ;;  %v224_v34 = vadd.f32 %v191_v32, %v38_v26 }
  0xa1   :  { %244 = vst.msk [vmem:[%s580_s2 + $0x40] sm:$0xff] %vm16_vm1, %v227_v29 }
  0xa2   :  { %248 = vst.msk [vmem:[%s580_s2 + $0x60] sm:$0xff] %vm16_vm1, %v231_v30 }
  0xa3   :  { %237 = vst.msk [vmem:[%s580_s2 + $0x8] sm:$0xff] %vm16_vm1, %v220_v33 }
  0xa4   :  { %241 = vst.msk [vmem:[%s580_s2 + $0x28] sm:$0xff] %vm16_vm1, %v224_v34 }
  0xa6   :  { %v201_v39 = vpop.f32.mrf.mxu2  ;;  %v211_v40 = vpop.f32.mrf.mxu3 }
  0xa7   :  { %v228_v41 = vadd.f32 %v201_v39, %v42_v35  ;;  %v232_v42 = vadd.f32 %v211_v40, %v46_v36  ;;  %v184_v43 = vpop.f32.mrf.mxu0  ;;  %v194_v44 = vpop.f32.mrf.mxu1 }
  0xa8   :  { %v221_v45 = vadd.f32 %v184_v43, %v35_v37  ;;  %v225_v46 = vadd.f32 %v194_v44, %v39_v38 }
  0xa9   :  { %245 = vst.msk [vmem:[%s580_s2 + $0x48] sm:$0xff] %vm16_vm1, %v228_v41 }
  0xaa   :  { %249 = vst.msk [vmem:[%s580_s2 + $0x68] sm:$0xff] %vm16_vm1, %v232_v42 }
  0xab   :  { %238 = vst.msk [vmem:[%s580_s2 + $0x10] sm:$0xff] %vm16_vm1, %v221_v45 }
  0xac   :  { %242 = vst.msk [vmem:[%s580_s2 + $0x30] sm:$0xff] %vm16_vm1, %v225_v46 }
  0xae   :  { %v204_v51 = vpop.f32.mrf.mxu2  ;;  %v214_v52 = vpop.f32.mrf.mxu3 }
  0xaf   :  { %v229_v53 = vadd.f32 %v204_v51, %v43_v47  ;;  %v233_v54 = vadd.f32 %v214_v52, %v47_v48  ;;  %v186_v55 = vpop.f32.mrf.mxu0  ;;  %v196_v56 = vpop.f32.mrf.mxu1 }
  0xb0   :  { %v222_v57 = vadd.f32 %v186_v55, %v36_v49  ;;  %v226_v58 = vadd.f32 %v196_v56, %v40_v50 }
  0xb1   :  { %246 = vst.msk [vmem:[%s580_s2 + $0x50] sm:$0xff] %vm16_vm1, %v229_v53 }
  0xb2   :  { %250 = vst.msk [vmem:[%s580_s2 + $0x70] sm:$0xff] %vm16_vm1, %v233_v54 }
  0xb3   :  { %239 = vst.msk [vmem:[%s580_s2 + $0x18] sm:$0xff] %vm16_vm1, %v222_v57 }
  0xb4   :  { %243 = vst.msk [vmem:[%s580_s2 + $0x38] sm:$0xff] %vm16_vm1, %v226_v58 }
  0xb6   :  { %v206_v61 = vpop.f32.mrf.mxu2  ;;  %v216_v62 = vpop.f32.mrf.mxu3 }
  0xb7   :  { %v230_v63 = vadd.f32 %v206_v61, %v44_v59  ;;  %v234_v0 = vadd.f32 %v216_v62, %v48_v60 }
  0xb9   :  { %247 = vst.msk [vmem:[%s580_s2 + $0x58] sm:$0xff] %vm16_vm1, %v230_v63 }
  0xba   :  { %251 = vst.msk [vmem:[%s580_s2 + $0x78] sm:$0xff] %vm16_vm1, %v234_v0 }

// kernel: residual_block_forward.17
= control target key start
LH: loop header
LB: loop body
LE: loop exit
PB: predicated region body
PF: predicated region fallthrough
CT: control target
= control target key end

     0   :  { %vm121_vm0 = vcmask 64512   ;;  %s371_s0 = inlined_call_operand.vmem [shape: f32[128,8], index: 0, kind: input, shape index: {}]   ;;  %s372_s1 = inlined_call_operand.vmem [shape: f32[1,8], index: 1, kind: input, shape index: {}]   ;;  %s373_s2 = inlined_call_operand.vmem [shape: f32[1,8], index: 2, kind: input, shape index: {}]   ;;  %s374_s3 = inlined_call_operand.vmem [shape: f32[128,8], index: 3, kind: input, shape index: {}]   ;;  %s375_s4 = inlined_call_operand.vmem [shape: f32[128,8], index: 4, kind: output, shape index: {}]  }
   0x1   :  { %v17_v0 = vld [vmem:[%s371_s0] sm:$0xff]  ;;  %v18_v4 = vld [vmem:[%s371_s0 + $0x8] sm:$0xff]  ;;  %v19_v5 = vld [vmem:[%s371_s0 + $0x10] sm:$0xff] }
   0x2   :  { %v175_v1 = vld [vmem:[%s372_s1] ss:$0 sm:$0xff]  ;;  %v74_v8 = vld [vmem:[%s374_s3 + $0x8] sm:$0xff]  ;;  %v20_v10 = vld [vmem:[%s371_s0 + $0x18] sm:$0xff] }
   0x3   :  { %v180_v2 = vld [vmem:[%s373_s2] ss:$0 sm:$0xff]  ;;  %v37_v3 = vmul.f32 %v175_v1, %v17_v0  ;;  %v38_v7 = vmul.f32 %v175_v1, %v18_v4  ;;  %v39_v9 = vmul.f32 %v175_v1, %v19_v5  ;;  %v75_v12 = vld [vmem:[%s374_s3 + $0x10] sm:$0xff]  ;;  %v40_v13 = vmul.f32 %v175_v1, %v20_v10  ;;  %v22_v15 = vld [vmem:[%s371_s0 + $0x28] sm:$0xff] }
   0x4   :  { %v73_v6 = vld [vmem:[%s374_s3] sm:$0xff]  ;;  %v76_v18 = vld [vmem:[%s374_s3 + $0x18] sm:$0xff]  ;;  %v42_v20 = vmul.f32 %v175_v1, %v22_v15  ;;  %v23_v21 = vld [vmem:[%s371_s0 + $0x30] sm:$0xff] }
   0x5   :  { %v57_v11 = vadd.f32 %v180_v2, %v37_v3  ;;  %v21_v14 = vld [vmem:[%s371_s0 + $0x20] sm:$0xff]  ;;  %v58_v16 = vadd.f32 %v180_v2, %v38_v7  ;;  %v59_v17 = vadd.f32 %v180_v2, %v39_v9  ;;  %v60_v23 = vadd.f32 %v180_v2, %v40_v13  ;;  %v78_v25 = vld [vmem:[%s374_s3 + $0x28] sm:$0xff]  ;;  %v24_v27 = vld [vmem:[%s371_s0 + $0x38] sm:$0xff] }
   0x6   :  { %v41_v19 = vmul.f32 %v175_v1, %v21_v14  ;;  %v77_v24 = vld [vmem:[%s374_s3 + $0x20] sm:$0xff]  ;;  %v43_v26 = vmul.f32 %v175_v1, %v23_v21  ;;  %v62_v31 = vadd.f32 %v180_v2, %v42_v20  ;;  %v79_v32 = vld [vmem:[%s374_s3 + $0x30] sm:$0xff]  ;;  %v44_v37 = vmul.f32 %v175_v1, %v24_v27  ;;  %v26_v38 = vld [vmem:[%s371_s0 + $0x48] sm:$0xff] }
   0x7   :  { %v89_v22 = vadd.f32 %v73_v6, %v57_v11  ;;  %v90_v28 = vadd.f32 %v74_v8, %v58_v16  ;;  %v91_v29 = vadd.f32 %v75_v12, %v59_v17  ;;  %v25_v33 = vld [vmem:[%s371_s0 + $0x40] sm:$0xff]  ;;  %v92_v35 = vadd.f32 %v76_v18, %v60_v23  ;;  %v27_v39 = vld [vmem:[%s371_s0 + $0x50] sm:$0xff]  ;;  %v80_v44 = vld [vmem:[%s374_s3 + $0x38] sm:$0xff] }
   0x8   :  { %v61_v30 = vadd.f32 %v180_v2, %v41_v19  ;;  %v63_v36 = vadd.f32 %v180_v2, %v43_v26  ;;  %v94_v43 = vadd.f32 %v78_v25, %v62_v31  ;;  %v28_v45 = vld [vmem:[%s371_s0 + $0x58] sm:$0xff]  ;;  %v64_v48 = vadd.f32 %v180_v2, %v44_v37  ;;  %v29_v50 = vld [vmem:[%s371_s0 + $0x60] sm:$0xff]  ;;  %v30_v51 = vld [vmem:[%s371_s0 + $0x68] sm:$0xff] }
   0x9   :  { %v105_v34 = vmax.f32 %v89_v22, 0.0  ;;  %v106_v40 = vmax.f32 %v90_v28, 0.0  ;;  %v107_v41 = vmax.f32 %v91_v29, 0.0  ;;  %v108_v46 = vmax.f32 %v92_v35, 0.0  ;;  %v81_v54 = vld [vmem:[%s374_s3 + $0x40] sm:$0xff]  ;;  %v31_v57 = vld [vmem:[%s371_s0 + $0x70] sm:$0xff] }
   0xa   :  { %v93_v42 = vadd.f32 %v77_v24, %v61_v30  ;;  %v95_v47 = vadd.f32 %v79_v32, %v63_v36  ;;  %v45_v49 = vmul.f32 %v175_v1, %v25_v33  ;;  %v110_v53 = vmax.f32 %v94_v43, 0.0  ;;  %v82_v61 = vld [vmem:[%s374_s3 + $0x48] sm:$0xff]  ;;  %v83_v62 = vld [vmem:[%s374_s3 + $0x50] sm:$0xff]  ;;  %v84_v4 = vld [vmem:[%s374_s3 + $0x58] sm:$0xff] }
   0xb   :  { %122 = vst.msk [vmem:[%s375_s4] sm:$0xff] %vm121_vm0, %v105_v34  ;;  %v46_v55 = vmul.f32 %v175_v1, %v26_v38  ;;  %v47_v56 = vmul.f32 %v175_v1, %v27_v39  ;;  %v96_v59 = vadd.f32 %v80_v44, %v64_v48  ;;  %v48_v63 = vmul.f32 %v175_v1, %v28_v45  ;;  %v32_v7 = vld [vmem:[%s371_s0 + $0x78] sm:$0xff]  ;;  %v85_v11 = vld [vmem:[%s374_s3 + $0x60] sm:$0xff]  ;;  %v86_v12 = vld [vmem:[%s374_s3 + $0x68] sm:$0xff] }
   0xc   :  { %123 = vst.msk [vmem:[%s375_s4 + $0x8] sm:$0xff] %vm121_vm0, %v106_v40  ;;  %v109_v52 = vmax.f32 %v93_v42, 0.0  ;;  %v111_v58 = vmax.f32 %v95_v47, 0.0  ;;  %v65_v60 = vadd.f32 %v180_v2, %v45_v49  ;;  %v49_v5 = vmul.f32 %v175_v1, %v29_v50  ;;  %v87_v18 = vld [vmem:[%s374_s3 + $0x70] sm:$0xff]  ;;  %v88_v27 = vld [vmem:[%s374_s3 + $0x78] sm:$0xff] }
   0xd   :  { %124 = vst.msk [vmem:[%s375_s4 + $0x10] sm:$0xff] %vm121_vm0, %v107_v41  ;;  %v66_v0 = vadd.f32 %v180_v2, %v46_v55  ;;  %v67_v3 = vadd.f32 %v180_v2, %v47_v56  ;;  %v50_v6 = vmul.f32 %v175_v1, %v30_v51  ;;  %v112_v8 = vmax.f32 %v96_v59, 0.0 }
   0xe   :  { %125 = vst.msk [vmem:[%s375_s4 + $0x18] sm:$0xff] %vm121_vm0, %v108_v46  ;;  %v97_v9 = vadd.f32 %v81_v54, %v65_v60  ;;  %v68_v10 = vadd.f32 %v180_v2, %v48_v63  ;;  %v51_v13 = vmul.f32 %v175_v1, %v31_v57  ;;  %v69_v16 = vadd.f32 %v180_v2, %v49_v5 }
   0xf   :  { %126 = vst.msk [vmem:[%s375_s4 + $0x20] sm:$0xff] %vm121_vm0, %v109_v52  ;;  %v98_v14 = vadd.f32 %v82_v61, %v66_v0  ;;  %v99_v15 = vadd.f32 %v83_v62, %v67_v3  ;;  %v70_v17 = vadd.f32 %v180_v2, %v50_v6  ;;  %v52_v22 = vmul.f32 %v175_v1, %v32_v7 }
  0x10   :  { %127 = vst.msk [vmem:[%s375_s4 + $0x28] sm:$0xff] %vm121_vm0, %v110_v53  ;;  %v113_v19 = vmax.f32 %v97_v9, 0.0  ;;  %v100_v20 = vadd.f32 %v84_v4, %v68_v10  ;;  %v71_v21 = vadd.f32 %v180_v2, %v51_v13  ;;  %v101_v25 = vadd.f32 %v85_v11, %v69_v16 }
  0x11   :  { %128 = vst.msk [vmem:[%s375_s4 + $0x30] sm:$0xff] %vm121_vm0, %v111_v58  ;;  %v114_v23 = vmax.f32 %v98_v14, 0.0  ;;  %v115_v24 = vmax.f32 %v99_v15, 0.0  ;;  %v102_v26 = vadd.f32 %v86_v12, %v70_v17  ;;  %v72_v29 = vadd.f32 %v180_v2, %v52_v22 }
  0x12   :  { %129 = vst.msk [vmem:[%s375_s4 + $0x38] sm:$0xff] %vm121_vm0, %v112_v8  ;;  %v116_v28 = vmax.f32 %v100_v20, 0.0  ;;  %v103_v1 = vadd.f32 %v87_v18, %v71_v21  ;;  %v117_v30 = vmax.f32 %v101_v25, 0.0 }
  0x13   :  { %130 = vst.msk [vmem:[%s375_s4 + $0x40] sm:$0xff] %vm121_vm0, %v113_v19  ;;  %v118_v31 = vmax.f32 %v102_v26, 0.0  ;;  %v104_v33 = vadd.f32 %v88_v27, %v72_v29 }
  0x14   :  { %131 = vst.msk [vmem:[%s375_s4 + $0x48] sm:$0xff] %vm121_vm0, %v114_v23  ;;  %v119_v32 = vmax.f32 %v103_v1, 0.0 }
  0x15   :  { %132 = vst.msk [vmem:[%s375_s4 + $0x50] sm:$0xff] %vm121_vm0, %v115_v24  ;;  %v120_v2 = vmax.f32 %v104_v33, 0.0 }
  0x16   :  { %133 = vst.msk [vmem:[%s375_s4 + $0x58] sm:$0xff] %vm121_vm0, %v116_v28 }
  0x17   :  { %134 = vst.msk [vmem:[%s375_s4 + $0x60] sm:$0xff] %vm121_vm0, %v117_v30 }
  0x18   :  { %135 = vst.msk [vmem:[%s375_s4 + $0x68] sm:$0xff] %vm121_vm0, %v118_v31 }
  0x19   :  { %136 = vst.msk [vmem:[%s375_s4 + $0x70] sm:$0xff] %vm121_vm0, %v119_v32 }
  0x1a   :  { %137 = vst.msk [vmem:[%s375_s4 + $0x78] sm:$0xff] %vm121_vm0, %v120_v2 }

</bundles_post_ra>
